<compile_context>
chip_gen: v5e
topology: v5e:2x2
jax: 0.10.0
libtpu: 0.0.40
codegen_flags: <defaults>
</compile_context>

<pallas_src>
import functools

import jax
import jax.numpy as jnp
from jax import lax
from jax.experimental import pallas as pl
from jax.experimental.pallas import tpu as pltpu


# ----------------------------------------------------------------- kernel 1 --
def _latent_kv_kernel(x_ref, wl_ref, bl_ref, wkv_ref, bkv_ref, lat_ref, kv_ref):
    """latent = x@Wl + bl ; kv = latent@[Wk|Wv] + [bk|bv] for one seq tile."""
    xb = x_ref[0].astype(jnp.bfloat16)                                # (TS, D)
    lat = jnp.dot(xb, wl_ref[...], preferred_element_type=jnp.float32) + bl_ref[...]
    lat_ref[0] = lat.astype(lat_ref.dtype)                            # f32 cache
    kv = jnp.dot(lat.astype(jnp.bfloat16), wkv_ref[...],
                 preferred_element_type=jnp.float32) + bkv_ref[...]
    kv_ref[0] = kv.astype(kv_ref.dtype)                               # bf16 (TS, 2D)


# ----------------------------------------------------------------- kernel 2 --
def _attn_kernel(num_heads, head_dim,
                 x_ref, kv_ref, wq_ref, bq_ref, wo_ref, bo_ref, out_ref):
    """q-proj + per-head attention + out-proj for one (batch, q-tile) block."""
    tq, d = x_ref.shape[1], x_ref.shape[2]
    scale = 1.0 / (head_dim ** 0.5)

    xb = x_ref[0].astype(jnp.bfloat16)                                # (TQ, D)
    q = jnp.dot(xb, wq_ref[...], preferred_element_type=jnp.float32) + bq_ref[...]
    q = (q * scale).astype(jnp.bfloat16)                              # fold 1/sqrt(hd)

    kvv = kv_ref.at[0]                                                # ref view (T, 2D)

    y = jnp.zeros((tq, d), jnp.float32)
    for h in range(num_heads):                                        # static unroll
        lo = h * head_dim
        qh = q[:, lo:lo + head_dim]                                   # (TQ, hd) lane slice
        kh = kvv[:, lo:lo + head_dim]                                 # (T,  hd) bf16
        vh = kvv[:, d + lo:d + lo + head_dim]                         # (T,  hd) bf16

        s = lax.dot_general(qh, kh, (((1,), (1,)), ((), ())),
                            preferred_element_type=jnp.float32)       # (TQ, T)
        s = s - jnp.max(s, axis=-1, keepdims=True)
        p = jnp.exp(s)
        inv = pl.reciprocal(jnp.sum(p, axis=-1, keepdims=True), approx=True)

        o = jnp.dot(p.astype(jnp.bfloat16), vh,
                    preferred_element_type=jnp.float32)               # (TQ, hd)
        o = (o * inv).astype(jnp.bfloat16)                            # normalize post-PV

        # merged-head out-projection chunk: o_h @ Wo[h*hd:(h+1)*hd, :]
        y = y + jnp.dot(o, wo_ref[lo:lo + head_dim, :],
                        preferred_element_type=jnp.float32)

    out_ref[0] = (y + bo_ref[...]).astype(out_ref.dtype)


# ------------------------------------------------------------------ wrapper --
def latent_mha_forward(x, params, num_heads, q_block=256, kv_block=512):
    """x: (B, T, D) f32 -> (out (B,T,D) f32, {'latent': (B,T,L) f32})."""
    B, T, D = x.shape
    L = params["wl"].shape[1]
    assert D % num_heads == 0
    hd = D // num_heads

    # attention q-tile
    if T <= q_block:
        tq = T
    else:
        assert T % q_block == 0, "T must be a multiple of q_block"
        tq = q_block
    n_q = T // tq

    # kernel-1 sequence tile (mem-bound -> as large as convenient, decoupled from tq)
    if T <= kv_block:
        ts = T
    else:
        assert T % kv_block == 0, "T must be a multiple of kv_block"
        ts = kv_block
    n_s = T // ts

    # bf16 weights for the MXU; biases stay f32 (added after f32 accumulation).
    wq = params["wq"].astype(jnp.bfloat16)
    wl = params["wl"].astype(jnp.bfloat16)
    wo = params["wo"].astype(jnp.bfloat16)
    # Fuse per-head back-projections and K with V:
    # (nh, L, hd) -> (L, nh*hd); wkv = [Wk_flat | Wv_flat] of shape (L, 2D).
    wk = jnp.transpose(params["wk"], (1, 0, 2)).reshape(L, D)
    wv = jnp.transpose(params["wv"], (1, 0, 2)).reshape(L, D)
    wkv = jnp.concatenate([wk, wv], axis=1).astype(jnp.bfloat16)       # (L, 2D)
    bq = params["bq"].astype(jnp.float32)
    bl = params["bl"].astype(jnp.float32)
    bo = params["bo"].astype(jnp.float32)
    bkv = jnp.concatenate([params["bk"].reshape(1, D),
                           params["bv"].reshape(1, D)], axis=1).astype(jnp.float32)

    f32, bf16 = 4, 2
    mib = 1 << 20

    # ---- kernel 1: latent projection + fused K/V back-projection -----------
    k1_vmem = (2 * ts * D * f32                       # x tile (double-buffered)
               + 2 * ts * L * f32                     # latent out
               + 2 * ts * 2 * D * bf16                # kv out (bf16)
               + 2 * (D * L + L * 2 * D) * bf16       # wl, wkv
               + ts * (L + 2 * D) * f32)              # intermediates
    k1_cost = pl.CostEstimate(
        flops=2 * B * T * L * (D + 2 * D),
        transcendentals=0,
        bytes_accessed=B * T * (D * f32 + L * f32 + 2 * D * bf16)
                       + (D * L + 2 * L * D) * bf16)
    latent, kv = pl.pallas_call(
        _latent_kv_kernel,
        out_shape=(jax.ShapeDtypeStruct((B, T, L), jnp.float32),
                   jax.ShapeDtypeStruct((B, T, 2 * D), jnp.bfloat16)),
        grid_spec=pltpu.PrefetchScalarGridSpec(
            num_scalar_prefetch=0,
            grid=(B, n_s),
            in_specs=[
                pl.BlockSpec((1, ts, D), lambda b, s: (b, s, 0)),      # x tile
                pl.BlockSpec((D, L), lambda b, s: (0, 0)),             # wl
                pl.BlockSpec((1, L), lambda b, s: (0, 0)),             # bl
                pl.BlockSpec((L, 2 * D), lambda b, s: (0, 0)),         # wkv
                pl.BlockSpec((1, 2 * D), lambda b, s: (0, 0)),         # bkv
            ],
            out_specs=[
                pl.BlockSpec((1, ts, L), lambda b, s: (b, s, 0)),      # latent cache
                pl.BlockSpec((1, ts, 2 * D), lambda b, s: (b, s, 0)),  # kv (bf16)
            ],
        ),
        compiler_params=pltpu.CompilerParams(
            dimension_semantics=("parallel", "parallel"),
            vmem_limit_bytes=int(min(48 * mib, max(32 * mib, 2 * k1_vmem)))),
        cost_estimate=k1_cost,
    )(x, wl, bl, wkv, bkv)

    # ---- kernel 2: q projection + attention + output projection ------------
    attn_kernel = functools.partial(_attn_kernel, num_heads, hd)
    k2_vmem = (2 * tq * D * f32                       # x tile
               + 2 * T * 2 * D * bf16                 # kv (full seq, resident)
               + 2 * tq * D * f32                     # out tile
               + 2 * 2 * D * D * bf16                 # wq, wo
               + (2 * tq * D + 2 * tq * T + tq * D) * f32)   # intermediates
    k2_cost = pl.CostEstimate(
        flops=B * n_q * (2 * tq * D * D              # q projection
                         + 2 * tq * T * D            # q @ k^T (all heads)
                         + 2 * tq * T * D            # p @ v   (all heads)
                         + 2 * tq * D * D),          # output projection
        transcendentals=B * n_q * num_heads * tq * T,
        bytes_accessed=B * n_q * 2 * tq * D * f32 + B * T * 2 * D * bf16
                       + 2 * 2 * D * D * bf16)
    out = pl.pallas_call(
        attn_kernel,
        out_shape=jax.ShapeDtypeStruct((B, T, D), jnp.float32),
        grid_spec=pltpu.PrefetchScalarGridSpec(
            num_scalar_prefetch=0,
            grid=(B, n_q),
            in_specs=[
                pl.BlockSpec((1, tq, D), lambda b, qi: (b, qi, 0)),     # x (q tile)
                pl.BlockSpec((1, T, 2 * D), lambda b, qi: (b, 0, 0)),   # kv (full seq, resident)
                pl.BlockSpec((D, D), lambda b, qi: (0, 0)),             # wq
                pl.BlockSpec((1, D), lambda b, qi: (0, 0)),             # bq
                pl.BlockSpec((D, D), lambda b, qi: (0, 0)),             # wo
                pl.BlockSpec((1, D), lambda b, qi: (0, 0)),             # bo
            ],
            out_specs=pl.BlockSpec((1, tq, D), lambda b, qi: (b, qi, 0)),
        ),
        compiler_params=pltpu.CompilerParams(
            dimension_semantics=("parallel", "parallel"),
            vmem_limit_bytes=int(min(48 * mib, max(32 * mib, 2 * k2_vmem)))),
        cost_estimate=k2_cost,
    )(x, kv, wq, bq, wo, bo)

    return out, {"latent": latent}


# ---------------------------------------------------------------- reference --
def latent_mha_reference(x, params, num_heads):
    """Pure-JAX f32 reference mirroring the PyTorch forward (cache=None)."""
    B, T, D = x.shape
    hd = D // num_heads
    q = x @ params["wq"] + params["bq"][0]
    q = q.reshape(B, T, num_heads, hd).transpose(0, 2, 1, 3)
    latent = x @ params["wl"] + params["bl"][0]
    k = jnp.einsum("btl,nlh->bnth", latent, params["wk"]) + params["bk"][None, :, None, :]
    v = jnp.einsum("btl,nlh->bnth", latent, params["wv"]) + params["bv"][None, :, None, :]
    s = jnp.einsum("bnqh,bnkh->bnqk", q, k) / (hd ** 0.5)
    p = jax.nn.softmax(s, axis=-1)
    o = jnp.einsum("bnqk,bnkh->bnqh", p, v)
    o = o.transpose(0, 2, 1, 3).reshape(B, T, D)
    return o @ params["wo"] + params["bo"][0], latent


def init_params(key, hidden_dim, num_heads, latent_dim):
    hd = hidden_dim // num_heads
    ks = jax.random.split(key, 10)
    u = lambda k, shape, fan_in: jax.random.uniform(
        k, shape, jnp.float32, -1.0 / (fan_in ** 0.5), 1.0 / (fan_in ** 0.5))
    return {
        "wq": u(ks[0], (hidden_dim, hidden_dim), hidden_dim),
        "bq": u(ks[1], (1, hidden_dim), hidden_dim),
        "wl": u(ks[2], (hidden_dim, latent_dim), hidden_dim),
        "bl": u(ks[3], (1, latent_dim), hidden_dim),
        "wk": u(ks[4], (num_heads, latent_dim, hd), latent_dim),
        "bk": u(ks[5], (num_heads, hd), latent_dim),
        "wv": u(ks[6], (num_heads, latent_dim, hd), latent_dim),
        "bv": u(ks[7], (num_heads, hd), latent_dim),
        "wo": u(ks[8], (hidden_dim, hidden_dim), hidden_dim),
        "bo": u(ks[9], (1, hidden_dim), hidden_dim),
    }


if __name__ == "__main__":
    # Small but lane-dense shapes: D = 256, L = 128, head_dim = 128, T = 256.
    B, T = 2, 256
    hidden_dim, num_heads, latent_dim = 256, 2, 128

    key = jax.random.PRNGKey(0)
    kx, kp = jax.random.split(key)
    x = jax.random.normal(kx, (B, T, hidden_dim), jnp.float32)
    params = init_params(kp, hidden_dim, num_heads, latent_dim)

    # q_block=128 so the q-tile loop (n_q=2) actually exercises the resident-KV path.
    out, cache = latent_mha_forward(x, params, num_heads, q_block=128)
    out = jax.block_until_ready(out)
    latent = jax.block_until_ready(cache["latent"])

    out_ref, latent_ref = latent_mha_reference(x, params, num_heads)
    # bf16 MXU inputs + approx reciprocal -> looser tolerance than all-f32.
    assert jnp.allclose(latent, latent_ref, atol=5e-2, rtol=5e-2), "latent cache mismatch"
    assert jnp.allclose(out, out_ref, atol=5e-2, rtol=5e-2), "output mismatch"

    print("KERNEL_OK")
</pallas_src>

<mosaic_0001>
module attributes {stable_mosaic.version = 11 : i64} {
  func.func @_latent_kv_kernel(%arg0: i32, %arg1: i32, %arg2: memref<1x256x256xf32, #tpu.memory_space<vmem>>, %arg3: memref<256x128xbf16, #tpu.memory_space<vmem>>, %arg4: memref<1x128xf32, #tpu.memory_space<vmem>>, %arg5: memref<128x512xbf16, #tpu.memory_space<vmem>>, %arg6: memref<1x512xf32, #tpu.memory_space<vmem>>, %arg7: memref<1x256x128xf32, #tpu.memory_space<vmem>>, %arg8: memref<1x256x512xbf16, #tpu.memory_space<vmem>>) attributes {dimension_semantics = [#tpu.dimension_semantics<parallel>, #tpu.dimension_semantics<parallel>], iteration_bounds = array<i64: 2, 1>, scalar_prefetch = 0 : i64, scratch_operands = 0 : i64, tpu.core_type = #tpu.core_type<tc>, window_params = [{transform_indices = @transform_0, window_bounds = array<i64: 1, 256, 256>}, {pipeline_mode = #tpu.pipeline_mode<synchronous>, transform_indices = @transform_1, window_bounds = array<i64: 256, 128>}, {pipeline_mode = #tpu.pipeline_mode<synchronous>, transform_indices = @transform_2, window_bounds = array<i64: 1, 128>}, {pipeline_mode = #tpu.pipeline_mode<synchronous>, transform_indices = @transform_3, window_bounds = array<i64: 128, 512>}, {pipeline_mode = #tpu.pipeline_mode<synchronous>, transform_indices = @transform_4, window_bounds = array<i64: 1, 512>}, {transform_indices = @transform_5, window_bounds = array<i64: 1, 256, 128>}, {transform_indices = @transform_6, window_bounds = array<i64: 1, 256, 512>}]} {
    %c0 = arith.constant 0 : index
    %c0_0 = arith.constant 0 : index
    %c0_1 = arith.constant 0 : index
    %0 = vector.load %arg2[%c0, %c0_0, %c0_1] : memref<1x256x256xf32, #tpu.memory_space<vmem>>, vector<1x256x256xf32>
    %1 = vector.shape_cast %0 : vector<1x256x256xf32> to vector<256x256xf32>
    %2 = arith.truncf %1 : vector<256x256xf32> to vector<256x256xbf16>
    %c0_2 = arith.constant 0 : index
    %c0_3 = arith.constant 0 : index
    %3 = vector.load %arg3[%c0_2, %c0_3] : memref<256x128xbf16, #tpu.memory_space<vmem>>, vector<256x128xbf16>
    %cst = arith.constant dense<0.000000e+00> : vector<256x128xf32>
    %4 = tpu.matmul %2, %3, %cst {dimension_numbers = #tpu.dot_dimension_numbers<[1], [0], [0], [1], [0, 0, 1, 1], [], []>} : vector<256x256xbf16>, vector<256x128xbf16>, vector<256x128xf32> -> vector<256x128xf32>
    %c0_4 = arith.constant 0 : index
    %c0_5 = arith.constant 0 : index
    %5 = vector.load %arg4[%c0_4, %c0_5] : memref<1x128xf32, #tpu.memory_space<vmem>>, vector<1x128xf32>
    %6 = vector.broadcast %5 : vector<1x128xf32> to vector<256x128xf32>
    %7 = arith.addf %4, %6 : vector<256x128xf32>
    %c0_6 = arith.constant 0 : index
    %c0_7 = arith.constant 0 : index
    %c0_8 = arith.constant 0 : index
    %8 = vector.load %arg7[%c0_6, %c0_7, %c0_8] : memref<1x256x128xf32, #tpu.memory_space<vmem>>, vector<1x256x128xf32>
    %9 = vector.shape_cast %8 : vector<1x256x128xf32> to vector<256x128xf32>
    %10 = vector.shape_cast %7 : vector<256x128xf32> to vector<1x256x128xf32>
    tpu.vector_store %arg7[%c0_6, %c0_7, %c0_8], %10 {strides = array<i32>} : memref<1x256x128xf32, #tpu.memory_space<vmem>>, vector<1x256x128xf32>,
    %11 = arith.truncf %7 : vector<256x128xf32> to vector<256x128xbf16>
    %c0_9 = arith.constant 0 : index
    %c0_10 = arith.constant 0 : index
    %12 = vector.load %arg5[%c0_9, %c0_10] : memref<128x512xbf16, #tpu.memory_space<vmem>>, vector<128x512xbf16>
    %cst_11 = arith.constant dense<0.000000e+00> : vector<256x512xf32>
    %13 = tpu.matmul %11, %12, %cst_11 {dimension_numbers = #tpu.dot_dimension_numbers<[1], [0], [0], [1], [0, 0, 1, 1], [], []>} : vector<256x128xbf16>, vector<128x512xbf16>, vector<256x512xf32> -> vector<256x512xf32>
    %c0_12 = arith.constant 0 : index
    %c0_13 = arith.constant 0 : index
    %14 = vector.load %arg6[%c0_12, %c0_13] : memref<1x512xf32, #tpu.memory_space<vmem>>, vector<1x512xf32>
    %15 = vector.broadcast %14 : vector<1x512xf32> to vector<256x512xf32>
    %16 = arith.addf %13, %15 : vector<256x512xf32>
    %17 = arith.truncf %16 : vector<256x512xf32> to vector<256x512xbf16>
    %c0_14 = arith.constant 0 : index
    %c0_15 = arith.constant 0 : index
    %c0_16 = arith.constant 0 : index
    %18 = vector.load %arg8[%c0_14, %c0_15, %c0_16] : memref<1x256x512xbf16, #tpu.memory_space<vmem>>, vector<1x256x512xbf16>
    %19 = vector.shape_cast %18 : vector<1x256x512xbf16> to vector<256x512xbf16>
    %20 = vector.shape_cast %17 : vector<256x512xbf16> to vector<1x256x512xbf16>
    tpu.vector_store %arg8[%c0_14, %c0_15, %c0_16], %20 {strides = array<i32>} : memref<1x256x512xbf16, #tpu.memory_space<vmem>>, vector<1x256x512xbf16>,
    return
  }
  func.func @transform_0(%arg0: i32, %arg1: i32) -> (i32, i32, i32) {
    %c0_i32 = arith.constant 0 : i32
    %c0_i32_0 = arith.constant 0 : i32
    return %arg0, %arg1, %c0_i32 : i32, i32, i32
  }
  func.func @transform_1(%arg0: i32, %arg1: i32) -> (i32, i32) {
    %c0_i32 = arith.constant 0 : i32
    %c0_i32_0 = arith.constant 0 : i32
    %c0_i32_1 = arith.constant 0 : i32
    return %c0_i32, %c0_i32_0 : i32, i32
  }
  func.func @transform_2(%arg0: i32, %arg1: i32) -> (i32, i32) {
    %c0_i32 = arith.constant 0 : i32
    %c0_i32_0 = arith.constant 0 : i32
    %c0_i32_1 = arith.constant 0 : i32
    return %c0_i32, %c0_i32_0 : i32, i32
  }
  func.func @transform_3(%arg0: i32, %arg1: i32) -> (i32, i32) {
    %c0_i32 = arith.constant 0 : i32
    %c0_i32_0 = arith.constant 0 : i32
    %c0_i32_1 = arith.constant 0 : i32
    return %c0_i32, %c0_i32_0 : i32, i32
  }
  func.func @transform_4(%arg0: i32, %arg1: i32) -> (i32, i32) {
    %c0_i32 = arith.constant 0 : i32
    %c0_i32_0 = arith.constant 0 : i32
    %c0_i32_1 = arith.constant 0 : i32
    return %c0_i32, %c0_i32_0 : i32, i32
  }
  func.func @transform_5(%arg0: i32, %arg1: i32) -> (i32, i32, i32) {
    %c0_i32 = arith.constant 0 : i32
    %c0_i32_0 = arith.constant 0 : i32
    return %arg0, %arg1, %c0_i32 : i32, i32, i32
  }
  func.func @transform_6(%arg0: i32, %arg1: i32) -> (i32, i32, i32) {
    %c0_i32 = arith.constant 0 : i32
    %c0_i32_0 = arith.constant 0 : i32
    return %arg0, %arg1, %c0_i32 : i32, i32, i32
  }
}

</mosaic_0001>

<bundles_post_ra>
// kernel: tpu_custom_call.1
= control target key start
LH: loop header
LB: loop body
LE: loop exit
PB: predicated region body
PF: predicated region fallthrough
CT: control target
= control target key end

     0   :  { %s2957_s0 = inlined_call_operand.hbm [shape: f32[2,256,256], index: 0, kind: input, shape index: {}]   ;;  %s2958_s1 = inlined_call_operand.hbm [shape: bf16[256,128], index: 1, kind: input, shape index: {}]   ;;  %s2959_s2 = inlined_call_operand.vmem [shape: f32[1,128], index: 2, kind: input, shape index: {}]   ;;  %s2960_s3 = inlined_call_operand.hbm [shape: bf16[128,512], index: 3, kind: input, shape index: {}]   ;;  %s2961_s4 = inlined_call_operand.hbm [shape: f32[1,512], index: 4, kind: input, shape index: {}]   ;;  %s2962_s5 = inlined_call_operand.hbm [shape: f32[2,256,128], index: 5, kind: output, shape index: {0}]   ;;  %s2963_s6 = inlined_call_operand.hbm [shape: bf16[2,256,512], index: 6, kind: output, shape index: {1}]  }
   0x1   :  { %2967 = sst [smem:[#allocation19_spill]] %s2958_s1 }
   0x2   :  { %2968 = sst [smem:[#allocation20_spill]] %s2960_s3 }
   0x3   :  { %2969 = sst [smem:[#allocation21_spill]] %s2961_s4 }
   0x4   :  { %12 = vsyncpa [#allocation3], 0 }
   0x5   :  { %14 = vsyncpa [#allocation3 + $0x1], 0 }
   0x6   :  { %15 = vsyncpa [#allocation6], 0 }
   0x7   :  { %16 = vsyncpa [#allocation9], 0 }
   0x8   :  { %17 = vsyncpa [#allocation4], 0 }
   0x9   :  { %19 = vsyncpa [#allocation4 + $0x1], 0 }
   0xa   :  { %20 = vsyncpa [#allocation12], 0 }
   0xb   :  { %22 = vsyncpa [#allocation12 + $0x1], 0  ;;  %s2371_s21 = smov 0   ;;  %s2373_s22 = smov 0  }
   0xc   :  { %s2375_s23 = smov 0   ;;  %s2377_s24 = smov 0  }
   0xd   :  { %s2379_s25 = smov 0   ;;  %s2381_s26 = smov 0  }
   0xe LB: > { %s1690_s27 = sadd.s32 4294967295, %s2323_s26   ;;  %s1691_s28 = sadd.s32 4294967294, %s2323_s26   ;;  %s2323_s26 = sphi %s2381_s26, %s28_s26   ;;  %s2319_s25 = sphi %s2379_s25, %s2989_s25   ;;  %s2315_s24 = sphi %s2377_s24, %s2988_s24   ;;  %s2311_s23 = sphi %s2375_s23, %s2987_s23   ;;  %s2307_s22 = sphi %s2373_s22, %s2986_s22   ;;  %s2303_s21 = sphi %s2371_s21, %s2985_s21  }
   0xf   : > { %p62_p0 = scmp.ne.s32.totalorder %s2307_s22, %s2303_s21  ;;  %p2405_p1 = scmp.eq.s32.totalorder %s1690_s27, 0 }
  0x10   : > { %p2409_p2 = scmp.eq.s32.totalorder %s1690_s27, 1  ;;  %p178_p3 = scmp.eq.s32.totalorder %s1691_s28, 1 }
  0x11   : > { %p2415_p4 = por %p2405_p1, %p62_p0  ;;  %p1692_p5 = scmp.ge.s32.totalorder %s2323_s26, 1 }
  0x12   : > { %p2420_p6 = por %p178_p3, %p62_p0  ;;  %p213_p7 = scmp.lt.s32.totalorder %s2323_s26, 3 }
  0x13   : > { %s2974_s1 = sld [smem:[#allocation19_spill]]  ;;  %s2325_s13 = smov [#allocation5]  }
  0x14   : > { %p2428_p8 = pnand %p1692_p5, %p213_p7  ;;  %s226_s14 = sshll.u32 %s2325_s13, 4  ;;  %s227_s14 = int_to_ptr.vmem [resolvable:$true] %s226_s14 }
  0x15   : > { %p1696_p11 = scmp.ge.s32.totalorder %s2323_s26, 2  ;;  %s2977_s3 = sld [smem:[#allocation20_spill]] }
  0x16   : > { %p1992_p9 = pneg %p2428_p8  ;;  %s2326_s19 = smov 64  }
  0x17   : > { %s2327_s20 = smov 4   ;;  %s2328_s27 = smov [#allocation7]  }
  0x18   : > { %p2436_p10 = pnand %p1992_p9, %p2405_p1  ;;  %s243_s28 = sshll.u32 %s2328_s27, 4  ;;  %s244_s28 = int_to_ptr.vmem [resolvable:$true] %s243_s28 }
  0x19   : > { %s224_s11 = sshll.u32 %s2974_s1, 4  ;;  %s2964_s9 = smov 256   ;;  %s225_s11 = int_to_ptr.hbm [resolvable:$true] %s224_s11 }
  0x1a   : > { %1995 = dma.hbm_to_vmem [thread:$0]  (!%p2436_p10), %s225_s11, 2048, %s227_s14, [#allocation6], %s2326_s19, %s2326_s19, %s2327_s20  }
  0x1b   : > { %s241_s18 = sshll.u32 %s2977_s3, 4  ;;  %s2965_s10 = smov 16   ;;  %s242_s18 = int_to_ptr.hbm [resolvable:$true] %s241_s18 }
  0x1c   : > { %1998 = dma.hbm_to_vmem [thread:$0]  (!%p2436_p10), %s242_s18, 4096, %s244_s28, [#allocation6], %s2964_s9, %s2964_s9, %s2965_s10  }
  0x1d   : > { %s2978_s4 = sld [smem:[#allocation21_spill]]  ;;  %s2331_s11 = smov [#allocation8]  }
  0x1e   : > { %s258_s14 = sshll.u32 %s2331_s11, 4  ;;  %s49_s19 = sadd.s32 1, %s2311_s23  ;;  %s259_s14 = int_to_ptr.vmem [resolvable:$true] %s258_s14 }
  0x1f   : > { %s40_s20 = sadd.s32 1, %s2319_s25  ;;  %p56_p12 = scmp.ne.s32.totalorder %s2311_s23, %s2307_s22 }
  0x20   : > { %p42_p13 = scmp.ge.s32.totalorder %s40_s20, 2  ;;  %p57_p0 = scmp.eq.s32.totalorder %s2323_s26, 0 }
  0x21   : > { %p2463_p3 = por %p2409_p2, %p56_p12  ;;  %p2016_p5 = scmp.lt.s32.totalorder %s2323_s26, 2 }
  0x22   : > { %s2991_s20 = smov (%p42_p13, %s40_s20), 0  ;;  %p2470_p7 = por %p57_p0, %p56_p12 }
  0x23   : > { %s256_s17 = sshll.u32 %s2978_s4, 4  ;;  %2980 = sst [smem:[#allocation18_spill]] %s2991_s20  ;;  %s257_s17 = int_to_ptr.hbm [resolvable:$true] %s256_s17 }
  0x24   : > { %2001 = dma.hbm_to_vmem [thread:$0]  (!%p2436_p10), %s257_s17, 64, %s259_s14, [#allocation9]  }
  0x25   : > { %s269_s15 = sand.u32 1, %s2311_s23   ;;  %s44_s28 = ssub.s32 %s2319_s25, %s2991_s20 }
  0x26   : > { %p47_p9 = scmp.eq.s32.totalorder %s44_s28, 0  ;;  %s1697_s13 = sshll.u32 %s269_s15, 9 }
  0x27   : > { %s1907_s16 = sshll.u32 %s2319_s25, 9  ;;  %s273_s9 = scalar_lea.vmem [#allocation2], %s1697_s13 }
  0x28   : > { %s2479_s30 = scalar_select %p47_p9, %s2311_s23, %s49_s19  }
  0x29   : > { %s281_s14 = scalar_lea.hbm %s2957_s0, %s1907_s16  ;;  %s284_s10 = sshll.u32 %s273_s9, 4  ;;  %s285_s10 = int_to_ptr.vmem [resolvable:$true] %s284_s10 }
  0x2a   : > { %s282_s1 = sshll.u32 %s281_s14, 4  ;;  %p2003_p2 = pnand %p2016_p5, %p2470_p7  ;;  %s283_s1 = int_to_ptr.hbm [resolvable:$true] %s282_s1 }
  0x2b   : > { %s270_s3 = scalar_lea.sflag [#allocation3], %s269_s15  ;;  %s2982_s4 = smov 16  }
  0x2c   : > { %s2983_s20 = smov 256   ;;  %296 = sbr.rel (%p2428_p8) target bundleno = 614 (0x266), region = 40 }
  0x2d   : > { %2005 = dma.hbm_to_vmem [thread:$0]  (!%p2003_p2), %s283_s1, 8192, %s285_s10, %s270_s3, %s2983_s20, %s2983_s20, %s2982_s4  }
  0x2e   : > { %s2494_s19 = sand.u32 (!%p2428_p8), 1, %s2307_s22  }
  0x2f   : > { %s1701_s9 = sshll.u32 (!%p2428_p8), %s2494_s19, 9  ;;  %s299_s28 = scalar_lea.sflag (!%p2428_p8), [#allocation3], %s2494_s19 }
  0x30   : > { %s2500_s27 = scalar_lea.vmem (!%p2428_p8), [#allocation2], %s1701_s9 }
  0x31   : > { %2282 = dma.done.wait (%p2415_p4), %s299_s28, 8192  }
  0x32   : > { %2284 = vsyncadd (%p2415_p4), %s299_s28, 4294959104 }
  0x33   : > { %2286 = dma.done.wait (%p2405_p1), [#allocation6], 6144  }
  0x34   : > { %2288 = vsyncadd (%p2405_p1), [#allocation6], 4294961152 }
  0x35   : > { %2290 = dma.done.wait (%p2405_p1), [#allocation9], 64  }
  0x36   : > { %2292 = vsyncadd (%p2405_p1), [#allocation9], 4294967232  ;;  %v1915_v0 = vld [vmem:[#allocation5 + $0x38] sm:$0xff]  ;;  %v1914_v2 = vld [vmem:[#allocation5 + $0x30] sm:$0xff]  ;;  %s1705_s4 = sshll.u32 %s2494_s19, 8  ;;  %s2682_s7 = scalar_lea.vmem [#allocation11], %s1701_s9 }
  0x37   : > { %v1923_v1 = vld [vmem:[#allocation5 + $0x78] sm:$0xff]  ;;  %583 = vmatpush.bf16.msra.mxu0 %v1915_v0  ;;  %v1922_v3 = vld [vmem:[#allocation5 + $0x70] sm:$0xff]  ;;  %1958 = vmatpush.bf16.msra.mxu2 %v1915_v0  ;;  %v1913_v4 = vld [vmem:[#allocation5 + $0x28] sm:$0xff]  ;;  %s2585_s29 = scalar_lea.vmem [#allocation10], %s1705_s4  ;;  %s1956_s12 = sshll.u32 %s2315_s24, 8 }
  0x38   : > { %672 = vmatpush.bf16.msra.mxu1 %v1923_v1  ;;  %1966 = vmatpush.bf16.msra.mxu3 %v1923_v1  ;;  %v1921_v5 = vld [vmem:[#allocation5 + $0x68] sm:$0xff]  ;;  %v1912_v6 = vld [vmem:[#allocation5 + $0x20] sm:$0xff]  ;;  %v1911_v8 = vld [vmem:[#allocation5 + $0x18] sm:$0xff]  ;;  %s1514_s15 = scalar_lea.hbm %s2962_s5, %s1956_s12  ;;  %s1515_s13 = sshll.u32 %s2585_s29, 4  ;;  %s1516_s13 = int_to_ptr.vmem [resolvable:$true] %s1515_s13 }
  0x39   : > { %v1920_v7 = vld [vmem:[#allocation5 + $0x60] sm:$0xff]  ;;  %v1919_v9 = vld [vmem:[#allocation5 + $0x58] sm:$0xff]  ;;  %v1910_v10 = vld [vmem:[#allocation5 + $0x10] sm:$0xff]  ;;  %s1517_s16 = sshll.u32 %s1514_s15, 4  ;;  %s1496_s17 = scalar_lea.sflag [#allocation4], %s2494_s19  ;;  %s1518_s16 = int_to_ptr.hbm [resolvable:$true] %s1517_s16 }
  0x3a   : > { %v1918_v11 = vld [vmem:[#allocation5 + $0x50] sm:$0xff]  ;;  %v1909_v12 = vld [vmem:[#allocation5 + $0x8] sm:$0xff]  ;;  %v1908_v14 = vld [vmem:[#allocation5] sm:$0xff]  ;;  %s2215_s11 = sshra.s32 %s1518_s16, 4  ;;  %s2216_s11 = int_to_ptr.hbm [resolvable:$true] %s2215_s11 }
  0x3b   : > { %584 = vmatpush.bf16.msra.mxu0 %v1914_v2  ;;  %1959 = vmatpush.bf16.msra.mxu2 %v1914_v2  ;;  %v1917_v13 = vld [vmem:[#allocation5 + $0x48] sm:$0xff]  ;;  %v1916_v15 = vld [vmem:[#allocation5 + $0x40] sm:$0xff]  ;;  %v357_v17 = vld [vmem:[%s2500_s27 + $0x10] sm:$0xff]  ;;  %s2217_s14 = scalar_lea.hbm %s2216_s11, 256  ;;  %p2222_p10 = scmp.lt.s32.totalorder %s2216_s11, %s2962_s5 }
  0x3c   : > { %673 = vmatpush.bf16.msra.mxu1 %v1922_v3  ;;  %1967 = vmatpush.bf16.msra.mxu3 %v1922_v3  ;;  %v355_v16 = vld [vmem:[%s2500_s27] sm:$0xff]  ;;  %v356_v18 = vld [vmem:[%s2500_s27 + $0x8] sm:$0xff]  ;;  %v358_v19 = vld [vmem:[%s2500_s27 + $0x18] sm:$0xff]  ;;  %p2218_p1 = scmp.ne.s32.totalorder %s2216_s11, %s2217_s14 }
  0x3d   : > { %v1885_v20 = vld [vmem:[#allocation7 + $0xe0] sm:$0xf]  ;;  %v1954_v21 = vld [vmem:[#allocation7 + $0xec] sm:$0xf0]  ;;  %v1952_v22 = vld [vmem:[#allocation7 + $0xe4] sm:$0xf]  ;;  %v419_v35 = vpack.c.bf16 %v357_v17, %v355_v16  ;;  %v420_v36 = vpack.c.bf16 %v358_v19, %v356_v18 }
  0x3e   : > { %v1887_v23 = vld [vmem:[#allocation7 + $0xf0] sm:$0xf0]  ;;  %v387_v24 = vld [vmem:[%s2500_s27 + $0x100] sm:$0xff]  ;;  %v388_v26 = vld [vmem:[%s2500_s27 + $0x108] sm:$0xff]  ;;  %v1886_v30 = vor.u32 %v1954_v21, %v1885_v20  ;;  %p2219_p4 = pnand %p2218_p1, %p2463_p3 }
  0x3f   : > { %585 = vmatpush.bf16.msra.mxu0 %v1913_v4  ;;  %1960 = vmatpush.bf16.msra.mxu2 %v1913_v4  ;;  %v389_v25 = vld [vmem:[%s2500_s27 + $0x110] sm:$0xff]  ;;  %v390_v27 = vld [vmem:[%s2500_s27 + $0x118] sm:$0xff]  ;;  %v1893_v28 = vld [vmem:[#allocation7 + $0xe8] sm:$0xf]  ;;  %v1890_v31 = vor.u32 %v1952_v22, %v1887_v23 }
  0x40   : > { %674 = vmatpush.bf16.msra.mxu1 %v1921_v5  ;;  %1968 = vmatpush.bf16.msra.mxu3 %v1921_v5  ;;  %v1955_v29 = vld [vmem:[#allocation7 + $0xf4] sm:$0xf0]  ;;  %v1953_v32 = vld [vmem:[#allocation7 + $0xec] sm:$0xf]  ;;  %v1895_v33 = vld [vmem:[#allocation7 + $0xf8] sm:$0xf0]  ;;  %v435_v40 = vpack.c.bf16 %v389_v25, %v387_v24  ;;  %v436_v41 = vpack.c.bf16 %v390_v27, %v388_v26  ;;  %p2220_p8 = pneg %p2219_p4 }
  0x41   : > { %v1869_v34 = vld [vmem:[#allocation7 + $0xc0] sm:$0xf]  ;;  %v1950_v37 = vld [vmem:[#allocation7 + $0xcc] sm:$0xf0]  ;;  %v1948_v38 = vld [vmem:[#allocation7 + $0xc4] sm:$0xf]  ;;  %v1894_v42 = vor.u32 %v1955_v29, %v1893_v28  ;;  %v1898_v43 = vor.u32 %v1953_v32, %v1895_v33 }
  0x42   : > { %v1871_v39 = vld [vmem:[#allocation7 + $0xd0] sm:$0xf0]  ;;  %v1870_v44 = vor.u32 %v1950_v37, %v1869_v34  ;;  %v1877_v46 = vld [vmem:[#allocation7 + $0xc8] sm:$0xf]  ;;  %v1951_v47 = vld [vmem:[#allocation7 + $0xd4] sm:$0xf0] }
  0x43   : > { %586 = vmatpush.bf16.msra.mxu0 %v1912_v6  ;;  %1961 = vmatpush.bf16.msra.mxu2 %v1912_v6  ;;  %v1874_v45 = vor.u32 %v1948_v38, %v1871_v39  ;;  %v1949_v48 = vld [vmem:[#allocation7 + $0xcc] sm:$0xf]  ;;  %v1878_v49 = vor.u32 %v1951_v47, %v1877_v46  ;;  %v1879_v50 = vld [vmem:[#allocation7 + $0xd8] sm:$0xf0]  ;;  %v1853_v52 = vld [vmem:[#allocation7 + $0xa0] sm:$0xf] }
  0x44   : > { %675 = vmatpush.bf16.msra.mxu1 %v1920_v7  ;;  %1969 = vmatpush.bf16.msra.mxu3 %v1920_v7  ;;  %v1882_v51 = vor.u32 %v1949_v48, %v1879_v50  ;;  %v1946_v53 = vld [vmem:[#allocation7 + $0xac] sm:$0xf0]  ;;  %v1944_v54 = vld [vmem:[#allocation7 + $0xa4] sm:$0xf]  ;;  %v1855_v56 = vld [vmem:[#allocation7 + $0xb0] sm:$0xf0] }
  0x45   : > { %v1854_v55 = vor.u32 %v1946_v53, %v1853_v52  ;;  %v1858_v57 = vor.u32 %v1944_v54, %v1855_v56  ;;  %v359_v58 = vld [vmem:[%s2500_s27 + $0x20] sm:$0xff]  ;;  %v361_v59 = vld [vmem:[%s2500_s27 + $0x30] sm:$0xff]  ;;  %v360_v60 = vld [vmem:[%s2500_s27 + $0x28] sm:$0xff] }
  0x46   : > { %v362_v61 = vld [vmem:[%s2500_s27 + $0x38] sm:$0xff]  ;;  %v391_v62 = vld [vmem:[%s2500_s27 + $0x120] sm:$0xff]  ;;  %v393_v63 = vld [vmem:[%s2500_s27 + $0x130] sm:$0xff]  ;;  %v421_v2 = vpack.c.bf16 %v361_v59, %v359_v58 }
  0x47   : > { %587 = vmatpush.bf16.msra.mxu0 %v1911_v8  ;;  %1962 = vmatpush.bf16.msra.mxu2 %v1911_v8  ;;  %v392_v0 = vld [vmem:[%s2500_s27 + $0x128] sm:$0xff]  ;;  %v394_v1 = vld [vmem:[%s2500_s27 + $0x138] sm:$0xff]  ;;  %v422_v3 = vpack.c.bf16 %v362_v61, %v360_v60  ;;  %v437_v4 = vpack.c.bf16 %v393_v63, %v391_v62  ;;  %v1839_v16 = vld [vmem:[#allocation7 + $0x90] sm:$0xf0] }
  0x48   : > { %676 = vmatpush.bf16.msra.mxu1 %v1919_v9  ;;  %1970 = vmatpush.bf16.msra.mxu3 %v1919_v9  ;;  %v438_v5 = vpack.c.bf16 %v394_v1, %v392_v0  ;;  %v1861_v6 = vld [vmem:[#allocation7 + $0xa8] sm:$0xf]  ;;  %v1947_v7 = vld [vmem:[#allocation7 + $0xb4] sm:$0xf0]  ;;  %v1945_v8 = vld [vmem:[#allocation7 + $0xac] sm:$0xf] }
  0x49   : > { %v1862_v9 = vor.u32 %v1947_v7, %v1861_v6  ;;  %v363_v18 = vld [vmem:[%s2500_s27 + $0x40] sm:$0xff]  ;;  %v365_v19 = vld [vmem:[%s2500_s27 + $0x50] sm:$0xff]  ;;  %v364_v20 = vld [vmem:[%s2500_s27 + $0x48] sm:$0xff] }
  0x4a   : > { %v366_v21 = vld [vmem:[%s2500_s27 + $0x58] sm:$0xff]  ;;  %v395_v22 = vld [vmem:[%s2500_s27 + $0x140] sm:$0xff]  ;;  %v397_v23 = vld [vmem:[%s2500_s27 + $0x150] sm:$0xff]  ;;  %v423_v26 = vpack.c.bf16 %v365_v19, %v363_v18 }
  0x4b   : > { %588 = vmatpush.bf16.msra.mxu0 %v1910_v10  ;;  %1963 = vmatpush.bf16.msra.mxu2 %v1910_v10  ;;  %v1863_v10 = vld [vmem:[#allocation7 + $0xb8] sm:$0xf0]  ;;  %v396_v24 = vld [vmem:[%s2500_s27 + $0x148] sm:$0xff]  ;;  %v424_v27 = vpack.c.bf16 %v366_v21, %v364_v20  ;;  %v439_v28 = vpack.c.bf16 %v397_v23, %v395_v22  ;;  %v1938_v37 = vld [vmem:[#allocation7 + $0x6c] sm:$0xf0] }
  0x4c   : > { %677 = vmatpush.bf16.msra.mxu1 %v1918_v11  ;;  %1971 = vmatpush.bf16.msra.mxu3 %v1918_v11  ;;  %v1866_v11 = vor.u32 %v1945_v8, %v1863_v10  ;;  %v398_v25 = vld [vmem:[%s2500_s27 + $0x158] sm:$0xff]  ;;  %v1941_v32 = vld [vmem:[#allocation7 + $0x8c] sm:$0xf]  ;;  %v1936_v38 = vld [vmem:[#allocation7 + $0x64] sm:$0xf] }
  0x4d   : > { %v440_v29 = vpack.c.bf16 %v398_v25, %v396_v24  ;;  %v1847_v34 = vld [vmem:[#allocation7 + $0x98] sm:$0xf0]  ;;  %v399_v46 = vld [vmem:[%s2500_s27 + $0x160] sm:$0xff]  ;;  %v401_v47 = vld [vmem:[%s2500_s27 + $0x170] sm:$0xff] }
  0x4e   : > { %v400_v48 = vld [vmem:[%s2500_s27 + $0x168] sm:$0xff]  ;;  %v441_v52 = vpack.c.bf16 %v401_v47, %v399_v46  ;;  %v1831_v58 = vld [vmem:[#allocation7 + $0x78] sm:$0xf0]  ;;  %v1805_v60 = vld [vmem:[#allocation7 + $0x40] sm:$0xf] }
  0x4f   : > { %589 = vmatpush.bf16.msra.mxu0 %v1909_v12  ;;  %1964 = vmatpush.bf16.msra.mxu2 %v1909_v12  ;;  %v1837_v12 = vld [vmem:[#allocation7 + $0x80] sm:$0xf]  ;;  %v1829_v54 = vld [vmem:[#allocation7 + $0x68] sm:$0xf]  ;;  %v1937_v56 = vld [vmem:[#allocation7 + $0x6c] sm:$0xf] }
  0x50   : > { %678 = vmatpush.bf16.msra.mxu1 %v1917_v13  ;;  %1972 = vmatpush.bf16.msra.mxu3 %v1917_v13  ;;  %v1942_v13 = vld [vmem:[#allocation7 + $0x8c] sm:$0xf0]  ;;  %v1834_v59 = vor.u32 %v1937_v56, %v1831_v58  ;;  %v1932_v62 = vld [vmem:[#allocation7 + $0x44] sm:$0xf]  ;;  %v1807_v0 = vld [vmem:[#allocation7 + $0x50] sm:$0xf0] }
  0x51   : > { %v1934_v61 = vld [vmem:[#allocation7 + $0x4c] sm:$0xf0]  ;;  %v1810_v1 = vor.u32 %v1932_v62, %v1807_v0  ;;  %v403_v6 = vld [vmem:[%s2500_s27 + $0x180] sm:$0xff]  ;;  %v404_v8 = vld [vmem:[%s2500_s27 + $0x188] sm:$0xff] }
  0x52   : > { %v1806_v63 = vor.u32 %v1934_v61, %v1805_v60  ;;  %v405_v7 = vld [vmem:[%s2500_s27 + $0x190] sm:$0xff]  ;;  %v1815_v18 = vld [vmem:[#allocation7 + $0x58] sm:$0xf0]  ;;  %v1789_v20 = vld [vmem:[#allocation7 + $0x20] sm:$0xf] }
  0x53   : > { %590 = vmatpush.bf16.msra.mxu0 %v1908_v14  ;;  %1965 = vmatpush.bf16.msra.mxu2 %v1908_v14  ;;  %v1940_v14 = vld [vmem:[#allocation7 + $0x84] sm:$0xf]  ;;  %v1930_v21 = vld [vmem:[#allocation7 + $0x2c] sm:$0xf0]  ;;  %v1791_v24 = vld [vmem:[#allocation7 + $0x30] sm:$0xf0] }
  0x54   : > { %679 = vmatpush.bf16.msra.mxu1 %v1916_v15  ;;  %1973 = vmatpush.bf16.msra.mxu3 %v1916_v15  ;;  %v1838_v15 = vor.u32 %v1942_v13, %v1837_v12  ;;  %v1842_v17 = vor.u32 %v1940_v14, %v1839_v16  ;;  %v443_v12 = vpack.c.bf16 %v405_v7, %v403_v6  ;;  %v1813_v14 = vld [vmem:[#allocation7 + $0x48] sm:$0xf]  ;;  %v1933_v16 = vld [vmem:[#allocation7 + $0x4c] sm:$0xf]  ;;  %v1928_v22 = vld [vmem:[#allocation7 + $0x24] sm:$0xf] }
  0x55   : > { %v1818_v19 = vor.u32 %v1933_v16, %v1815_v18  ;;  %v1790_v23 = vor.u32 %v1930_v21, %v1789_v20  ;;  %v1794_v25 = vor.u32 %v1928_v22, %v1791_v24  ;;  %v1924_v46 = vld [vmem:[#allocation7 + $0x4] sm:$0xf]  ;;  %v412_v56 = vld [vmem:[%s2500_s27 + $0x1c8] sm:$0xff]  ;;  %v386_v7 = vld [vmem:[%s2500_s27 + $0xf8] sm:$0xff] }
  0x56   : > { %591 = vmatmul.bf16.vlgmr.msra.gmra.mxu0 %v419_v35  ;;  %631 = vmatmul.bf16.vlgmr.msra.gmra.mxu2 %v435_v40  ;;  %v1850_v35 = vor.u32 %v1941_v32, %v1847_v34  ;;  %v1823_v40 = vld [vmem:[#allocation7 + $0x70] sm:$0xf0]  ;;  %v408_v32 = vld [vmem:[%s2500_s27 + $0x1a8] sm:$0xff]  ;;  %v2581_v16 = vld [vmem:[%s2959_s2] ss:$0 sm:$0xff] }
  0x57   : > { %1011 = vmatpush.bf16.msrb.mxu2 %v1886_v30  ;;  %680 = vmatmul.bf16.vlgmr.msra.gmra.mxu1 %v420_v36  ;;  %v1845_v30 = vld [vmem:[#allocation7 + $0x88] sm:$0xf]  ;;  %v1821_v36 = vld [vmem:[#allocation7 + $0x60] sm:$0xf]  ;;  %v1925_v0 = vld [vmem:[#allocation7 + $0xc] sm:$0xf] }
  0x58   : > { %1100 = vmatpush.bf16.msrb.mxu3 %v1890_v31  ;;  %1189 = vmatpush.bf16.msrb.mxu0 %v1894_v42  ;;  %v1943_v31 = vld [vmem:[#allocation7 + $0x94] sm:$0xf0]  ;;  %v1822_v39 = vor.u32 %v1938_v37, %v1821_v36  ;;  %v367_v42 = vld [vmem:[%s2500_s27 + $0x60] sm:$0xff]  ;;  %v1781_v62 = vld [vmem:[#allocation7 + $0x8] sm:$0xf] }
  0x59   : > { %720 = vmatmul.bf16.vlgmr.msra.gmra.mxu3 %v436_v41  ;;  %1278 = vmatpush.bf16.msrb.mxu1 %v1898_v43  ;;  %v1846_v33 = vor.u32 %v1943_v31, %v1845_v30  ;;  %v1826_v41 = vor.u32 %v1936_v38, %v1823_v40  ;;  %v369_v43 = vld [vmem:[%s2500_s27 + $0x70] sm:$0xff]  ;;  %v407_v30 = vld [vmem:[%s2500_s27 + $0x1a0] sm:$0xff]  ;;  %v1797_v38 = vld [vmem:[#allocation7 + $0x28] sm:$0xf] }
  0x5a   : > { %v425_v50 = vpack.c.bf16 %v369_v43, %v367_v42  ;;  %v409_v31 = vld [vmem:[%s2500_s27 + $0x1b0] sm:$0xff]  ;;  %v1929_v40 = vld [vmem:[#allocation7 + $0x2c] sm:$0xf]  ;;  %v1799_v42 = vld [vmem:[#allocation7 + $0x38] sm:$0xf0] }
  0x5b   : > { %1012 = vmatpush.bf16.msrb.mxu2 %v1870_v44  ;;  %v368_v44 = vld [vmem:[%s2500_s27 + $0x68] sm:$0xff]  ;;  %v445_v36 = vpack.c.bf16 %v409_v31, %v407_v30  ;;  %v1802_v43 = vor.u32 %v1929_v40, %v1799_v42 }
  0x5c   : > { %1101 = vmatpush.bf16.msrb.mxu3 %v1874_v45  ;;  %1190 = vmatpush.bf16.msrb.mxu0 %v1878_v49  ;;  %v370_v45 = vld [vmem:[%s2500_s27 + $0x78] sm:$0xff]  ;;  %v384_v6 = vld [vmem:[%s2500_s27 + $0xe8] sm:$0xff] }
  0x5d   : > { %1279 = vmatpush.bf16.msrb.mxu1 %v1882_v51  ;;  %v402_v49 = vld [vmem:[%s2500_s27 + $0x178] sm:$0xff]  ;;  %v426_v51 = vpack.c.bf16 %v370_v45, %v368_v44  ;;  %v1773_v44 = vld [vmem:[#allocation7] sm:$0xf]  ;;  %v1926_v45 = vld [vmem:[#allocation7 + $0xc] sm:$0xf0] }
  0x5e   : > { %v442_v53 = vpack.c.bf16 %v402_v49, %v400_v48  ;;  %v1774_v47 = vor.u32 %v1926_v45, %v1773_v44  ;;  %v1775_v48 = vld [vmem:[#allocation7 + $0x10] sm:$0xf0] }
  0x5f   : > { %1013 = vmatpush.bf16.msrb.mxu2 %v1854_v55  ;;  %v1939_v55 = vld [vmem:[#allocation7 + $0x74] sm:$0xf0]  ;;  %v1778_v49 = vor.u32 %v1924_v46, %v1775_v48 }
  0x60   : > { %1102 = vmatpush.bf16.msrb.mxu3 %v1858_v57  ;;  %1191 = vmatpush.bf16.msrb.mxu0 %v1862_v9  ;;  %v1830_v57 = vor.u32 %v1939_v55, %v1829_v54  ;;  %v406_v9 = vld [vmem:[%s2500_s27 + $0x198] sm:$0xff]  ;;  %v411_v54 = vld [vmem:[%s2500_s27 + $0x1c0] sm:$0xff]  ;;  %v413_v55 = vld [vmem:[%s2500_s27 + $0x1d0] sm:$0xff] }
  0x61   : > { %1280 = vmatpush.bf16.msrb.mxu1 %v1866_v11  ;;  %v444_v13 = vpack.c.bf16 %v406_v9, %v404_v8  ;;  %v447_v60 = vpack.c.bf16 %v413_v55, %v411_v54  ;;  %v415_v8 = vld [vmem:[%s2500_s27 + $0x1e0] sm:$0xff]  ;;  %v417_v9 = vld [vmem:[%s2500_s27 + $0x1f0] sm:$0xff] }
  0x63   : > { %1014 = vmatpush.bf16.msrb.mxu2 %v1838_v15  ;;  %v1935_v15 = vld [vmem:[#allocation7 + $0x54] sm:$0xf0] }
  0x64   : > { %1103 = vmatpush.bf16.msrb.mxu3 %v1842_v17  ;;  %1192 = vmatpush.bf16.msrb.mxu0 %v1846_v33  ;;  %v1814_v17 = vor.u32 %v1935_v15, %v1813_v14  ;;  %v410_v33 = vld [vmem:[%s2500_s27 + $0x1b8] sm:$0xff]  ;;  %v449_v14 = vpack.c.bf16 %v417_v9, %v415_v8 }
  0x65   : > { %1281 = vmatpush.bf16.msrb.mxu1 %v1850_v35  ;;  %v446_v37 = vpack.c.bf16 %v410_v33, %v408_v32 }
  0x66   : > { %596 = vmatmul.bf16.gmra.mxu0 %v421_v2  ;;  %636 = vmatmul.bf16.gmra.mxu2 %v437_v4  ;;  %v371_v2 = vld [vmem:[%s2500_s27 + $0x80] sm:$0xff]  ;;  %v372_v4 = vld [vmem:[%s2500_s27 + $0x88] sm:$0xff] }
  0x67   : > { %685 = vmatmul.bf16.gmra.mxu1 %v422_v3  ;;  %1015 = vmatpush.bf16.msrb.mxu2 %v1822_v39  ;;  %v373_v3 = vld [vmem:[%s2500_s27 + $0x90] sm:$0xff]  ;;  %v1931_v39 = vld [vmem:[#allocation7 + $0x34] sm:$0xf0] }
  0x68   : > { %1104 = vmatpush.bf16.msrb.mxu3 %v1826_v41  ;;  %1193 = vmatpush.bf16.msrb.mxu0 %v1830_v57  ;;  %v427_v10 = vpack.c.bf16 %v373_v3, %v371_v2  ;;  %v1798_v41 = vor.u32 %v1931_v39, %v1797_v38  ;;  %v414_v57 = vld [vmem:[%s2500_s27 + $0x1d8] sm:$0xff] }
  0x69   : > { %725 = vmatmul.bf16.gmra.mxu3 %v438_v5  ;;  %1282 = vmatpush.bf16.msrb.mxu1 %v1834_v59  ;;  %v374_v5 = vld [vmem:[%s2500_s27 + $0x98] sm:$0xff]  ;;  %v448_v61 = vpack.c.bf16 %v414_v57, %v412_v56 }
  0x6a   : > { %v428_v11 = vpack.c.bf16 %v374_v5, %v372_v4  ;;  %v1783_v2 = vld [vmem:[#allocation7 + $0x18] sm:$0xf0]  ;;  %v383_v4 = vld [vmem:[%s2500_s27 + $0xe0] sm:$0xff]  ;;  %v385_v5 = vld [vmem:[%s2500_s27 + $0xf0] sm:$0xff] }
  0x6b   : > { %1016 = vmatpush.bf16.msrb.mxu2 %v1806_v63  ;;  %v1927_v63 = vld [vmem:[#allocation7 + $0x14] sm:$0xf0]  ;;  %v1786_v3 = vor.u32 %v1925_v0, %v1783_v2 }
  0x6c   : > { %1105 = vmatpush.bf16.msrb.mxu3 %v1810_v1  ;;  %1194 = vmatpush.bf16.msrb.mxu0 %v1814_v17  ;;  %v1782_v1 = vor.u32 %v1927_v63, %v1781_v62 }
  0x6d   : > { %1283 = vmatpush.bf16.msrb.mxu1 %v1818_v19 }
  0x6f   : > { %1017 = vmatpush.bf16.msrb.mxu2 %v1790_v23 }
  0x70   : > { %1106 = vmatpush.bf16.msrb.mxu3 %v1794_v25  ;;  %1195 = vmatpush.bf16.msrb.mxu0 %v1798_v41 }
  0x71   : > { %1284 = vmatpush.bf16.msrb.mxu1 %v1802_v43 }
  0x73   : > { %1018 = vmatpush.bf16.msrb.mxu2 %v1774_v47 }
  0x74   : > { %1107 = vmatpush.bf16.msrb.mxu3 %v1778_v49  ;;  %1196 = vmatpush.bf16.msrb.mxu0 %v1782_v1 }
  0x75   : > { %1285 = vmatpush.bf16.msrb.mxu1 %v1786_v3 }
  0x76   : > { %601 = vmatmul.bf16.gmra.mxu0 %v423_v26  ;;  %641 = vmatmul.bf16.gmra.mxu2 %v439_v28  ;;  %v375_v26 = vld [vmem:[%s2500_s27 + $0xa0] sm:$0xff]  ;;  %v376_v28 = vld [vmem:[%s2500_s27 + $0xa8] sm:$0xff] }
  0x77   : > { %690 = vmatmul.bf16.gmra.mxu1 %v424_v27  ;;  %v377_v27 = vld [vmem:[%s2500_s27 + $0xb0] sm:$0xff] }
  0x78   : > { %v429_v34 = vpack.c.bf16 %v377_v27, %v375_v26 }
  0x79   : > { %730 = vmatmul.bf16.gmra.mxu3 %v440_v29  ;;  %v378_v29 = vld [vmem:[%s2500_s27 + $0xb8] sm:$0xff] }
  0x7a   : > { %v430_v35 = vpack.c.bf16 %v378_v29, %v376_v28 }
  0x86   : > { %606 = vmatmul.bf16.gmra.mxu0 %v425_v50  ;;  %646 = vmatmul.bf16.gmra.mxu2 %v441_v52  ;;  %v379_v50 = vld [vmem:[%s2500_s27 + $0xc0] sm:$0xff]  ;;  %v380_v52 = vld [vmem:[%s2500_s27 + $0xc8] sm:$0xff] }
  0x87   : > { %695 = vmatmul.bf16.gmra.mxu1 %v426_v51  ;;  %v381_v51 = vld [vmem:[%s2500_s27 + $0xd0] sm:$0xff] }
  0x88   : > { %v431_v58 = vpack.c.bf16 %v381_v51, %v379_v50 }
  0x89   : > { %735 = vmatmul.bf16.gmra.mxu3 %v442_v53  ;;  %v382_v53 = vld [vmem:[%s2500_s27 + $0xd8] sm:$0xff] }
  0x8a   : > { %v432_v59 = vpack.c.bf16 %v382_v53, %v380_v52 }
  0x96   : > { %611 = vmatmul.bf16.gmra.mxu0 %v427_v10  ;;  %651 = vmatmul.bf16.gmra.mxu2 %v443_v12  ;;  %v416_v10 = vld [vmem:[%s2500_s27 + $0x1e8] sm:$0xff]  ;;  %v433_v12 = vpack.c.bf16 %v385_v5, %v383_v4 }
  0x97   : > { %700 = vmatmul.bf16.gmra.mxu1 %v428_v11  ;;  %v418_v11 = vld [vmem:[%s2500_s27 + $0x1f8] sm:$0xff]  ;;  %s2221_s27 = scalar_lea.hbm %s2962_s5, 512 }
  0x98   : > { %v450_v15 = vpack.c.bf16 %v418_v11, %v416_v10  ;;  %p2223_p12 = scmp.lt.s32.totalorder %s2221_s27, %s2217_s14 }
  0x99   : > { %740 = vmatmul.bf16.gmra.mxu3 %v444_v13  ;;  %v434_v13 = vpack.c.bf16 %v386_v7, %v384_v6 }
  0x9a   : > { %p2224_p13 = por %p2223_p12, %p2222_p10 }
  0x9c   : > { %p2225_p0 = pnand %p2224_p13, %p2220_p8 }
  0xa6   : > { %616 = vmatmul.bf16.gmra.mxu0 %v429_v34  ;;  %656 = vmatmul.bf16.gmra.mxu2 %v445_v36 }
  0xa7   : > { %705 = vmatmul.bf16.gmra.mxu1 %v430_v35 }
  0xa9   : > { %745 = vmatmul.bf16.gmra.mxu3 %v446_v37 }
  0xb6   : > { %621 = vmatmul.bf16.gmra.mxu0 %v431_v58  ;;  %661 = vmatmul.bf16.gmra.mxu2 %v447_v60 }
  0xb7   : > { %710 = vmatmul.bf16.gmra.mxu1 %v432_v59 }
  0xb9   : > { %750 = vmatmul.bf16.gmra.mxu3 %v448_v61 }
  0xc6   : > { %626 = vmatmul.bf16.gmra.mxu0 %v433_v12  ;;  %666 = vmatmul.bf16.gmra.mxu2 %v449_v14 }
  0xc7   : > { %715 = vmatmul.bf16.gmra.mxu1 %v434_v13 }
  0xc9   : > { %755 = vmatmul.bf16.gmra.mxu3 %v450_v15 }
  0xd3   : > { %v592_v17 = vpop.f32.mrf.mxu0 }
  0xd4   : > { %v681_v18 = vpop.f32.mrf.mxu1  ;;  %v593_v19 = vadd.f32 %v2581_v16, %v592_v17 }
  0xd6   : > { %v682_v20 = vadd.f32 %v681_v18, %v593_v19 }
  0xd8   : > { %761 = vst [vmem:[%s2585_s29] sm:$0xff] %v682_v20 }
  0xd9   : > { %v632_v21 = vpop.f32.mrf.mxu2 }
  0xda   : > { %v633_v24 = vadd.f32 %v2581_v16, %v632_v21 }
  0xdb   : > { %v594_v23 = vpop.f32.mrf.mxu0 }
  0xdc   : > { %v721_v22 = vpop.f32.mrf.mxu3  ;;  %v683_v25 = vpop.f32.mrf.mxu1  ;;  %v595_v26 = vadd.f32 %v2581_v16, %v594_v23 }
  0xdd   : > { %v722_v27 = vadd.f32 %v721_v22, %v633_v24 }
  0xde   : > { %v684_v28 = vadd.f32 %v683_v25, %v595_v26 }
  0xdf   : > { %777 = vst [vmem:[%s2585_s29 + $0x80] sm:$0xff] %v722_v27 }
  0xe0   : > { %762 = vst [vmem:[%s2585_s29 + $0x8] sm:$0xff] %v684_v28  ;;  %v793_v29 = vpack.c.bf16 %v684_v28, %v682_v20 }
  0xe1   : > { %v634_v30 = vpop.f32.mrf.mxu2 }
  0xe2   : > { %1019 = vmatmul.bf16.vlgmr.msrb.gmra.mxu2 %v793_v29  ;;  %1108 = vmatmul.bf16.vlgmr.msrb.gmra.mxu3 %v793_v29  ;;  %v635_v33 = vadd.f32 %v2581_v16, %v634_v30 }
  0xe3   : > { %1197 = vmatmul.bf16.vlgmr.msrb.gmra.mxu0 %v793_v29  ;;  %1286 = vmatmul.bf16.vlgmr.msrb.gmra.mxu1 %v793_v29  ;;  %v597_v32 = vpop.f32.mrf.mxu0 }
  0xe4   : > { %v723_v31 = vpop.f32.mrf.mxu3  ;;  %v686_v34 = vpop.f32.mrf.mxu1  ;;  %v598_v35 = vadd.f32 %v2581_v16, %v597_v32 }
  0xe5   : > { %v724_v36 = vadd.f32 %v723_v31, %v635_v33 }
  0xe6   : > { %v687_v37 = vadd.f32 %v686_v34, %v598_v35 }
  0xe7   : > { %778 = vst [vmem:[%s2585_s29 + $0x88] sm:$0xff] %v724_v36  ;;  %v2595_v38 = vpack.c.bf16 %v724_v36, %v722_v27 }
  0xe8   : > { %763 = vst [vmem:[%s2585_s29 + $0x10] sm:$0xff] %v687_v37 }
  0xe9   : > { %v637_v39 = vpop.f32.mrf.mxu2 }
  0xea   : > { %v638_v42 = vadd.f32 %v2581_v16, %v637_v39 }
  0xeb   : > { %v599_v41 = vpop.f32.mrf.mxu0 }
  0xec   : > { %v726_v40 = vpop.f32.mrf.mxu3  ;;  %v688_v43 = vpop.f32.mrf.mxu1  ;;  %v600_v44 = vadd.f32 %v2581_v16, %v599_v41 }
  0xed   : > { %v727_v45 = vadd.f32 %v726_v40, %v638_v42 }
  0xee   : > { %v689_v46 = vadd.f32 %v688_v43, %v600_v44 }
  0xef   : > { %779 = vst [vmem:[%s2585_s29 + $0x90] sm:$0xff] %v727_v45 }
  0xf0   : > { %764 = vst [vmem:[%s2585_s29 + $0x18] sm:$0xff] %v689_v46  ;;  %v794_v47 = vpack.c.bf16 %v689_v46, %v687_v37 }
  0xf1   : > { %v639_v48 = vpop.f32.mrf.mxu2 }
  0xf2   : > { %1024 = vmatmul.bf16.gmra.mxu2 %v794_v47  ;;  %1113 = vmatmul.bf16.gmra.mxu3 %v794_v47  ;;  %v640_v51 = vadd.f32 %v2581_v16, %v639_v48 }
  0xf3   : > { %1202 = vmatmul.bf16.gmra.mxu0 %v794_v47  ;;  %1291 = vmatmul.bf16.gmra.mxu1 %v794_v47  ;;  %v602_v50 = vpop.f32.mrf.mxu0 }
  0xf4   : > { %v728_v49 = vpop.f32.mrf.mxu3  ;;  %v691_v52 = vpop.f32.mrf.mxu1  ;;  %v603_v53 = vadd.f32 %v2581_v16, %v602_v50 }
  0xf5   : > { %v729_v54 = vadd.f32 %v728_v49, %v640_v51 }
  0xf6   : > { %v692_v55 = vadd.f32 %v691_v52, %v603_v53 }
  0xf7   : > { %780 = vst [vmem:[%s2585_s29 + $0x98] sm:$0xff] %v729_v54  ;;  %v2605_v56 = vpack.c.bf16 %v729_v54, %v727_v45 }
  0xf8   : > { %765 = vst [vmem:[%s2585_s29 + $0x20] sm:$0xff] %v692_v55 }
  0xf9   : > { %v642_v57 = vpop.f32.mrf.mxu2 }
  0xfa   : > { %v643_v60 = vadd.f32 %v2581_v16, %v642_v57 }
  0xfb   : > { %v604_v59 = vpop.f32.mrf.mxu0 }
  0xfc   : > { %v731_v58 = vpop.f32.mrf.mxu3  ;;  %v693_v61 = vpop.f32.mrf.mxu1  ;;  %v605_v62 = vadd.f32 %v2581_v16, %v604_v59 }
  0xfd   : > { %v732_v63 = vadd.f32 %v731_v58, %v643_v60 }
  0xfe   : > { %v694_v0 = vadd.f32 %v693_v61, %v605_v62 }
  0xff   : > { %781 = vst [vmem:[%s2585_s29 + $0xa0] sm:$0xff] %v732_v63 }
 0x100   : > { %766 = vst [vmem:[%s2585_s29 + $0x28] sm:$0xff] %v694_v0  ;;  %v795_v1 = vpack.c.bf16 %v694_v0, %v692_v55 }
 0x101   : > { %v644_v2 = vpop.f32.mrf.mxu2 }
 0x102   : > { %1029 = vmatmul.bf16.gmra.mxu2 %v795_v1  ;;  %1118 = vmatmul.bf16.gmra.mxu3 %v795_v1  ;;  %v645_v5 = vadd.f32 %v2581_v16, %v644_v2 }
 0x103   : > { %1207 = vmatmul.bf16.gmra.mxu0 %v795_v1  ;;  %1296 = vmatmul.bf16.gmra.mxu1 %v795_v1  ;;  %v607_v4 = vpop.f32.mrf.mxu0 }
 0x104   : > { %v733_v3 = vpop.f32.mrf.mxu3  ;;  %v696_v6 = vpop.f32.mrf.mxu1  ;;  %v608_v7 = vadd.f32 %v2581_v16, %v607_v4 }
 0x105   : > { %v734_v8 = vadd.f32 %v733_v3, %v645_v5 }
 0x106   : > { %v697_v9 = vadd.f32 %v696_v6, %v608_v7 }
 0x107   : > { %782 = vst [vmem:[%s2585_s29 + $0xa8] sm:$0xff] %v734_v8  ;;  %v2615_v10 = vpack.c.bf16 %v734_v8, %v732_v63 }
 0x108   : > { %767 = vst [vmem:[%s2585_s29 + $0x30] sm:$0xff] %v697_v9 }
 0x109   : > { %v647_v11 = vpop.f32.mrf.mxu2 }
 0x10a   : > { %v648_v14 = vadd.f32 %v2581_v16, %v647_v11 }
 0x10b   : > { %v609_v13 = vpop.f32.mrf.mxu0 }
 0x10c   : > { %v736_v12 = vpop.f32.mrf.mxu3  ;;  %v698_v15 = vpop.f32.mrf.mxu1  ;;  %v610_v17 = vadd.f32 %v2581_v16, %v609_v13 }
 0x10d   : > { %v737_v18 = vadd.f32 %v736_v12, %v648_v14 }
 0x10e   : > { %v699_v19 = vadd.f32 %v698_v15, %v610_v17 }
 0x10f   : > { %783 = vst [vmem:[%s2585_s29 + $0xb0] sm:$0xff] %v737_v18 }
 0x110   : > { %768 = vst [vmem:[%s2585_s29 + $0x38] sm:$0xff] %v699_v19  ;;  %v796_v20 = vpack.c.bf16 %v699_v19, %v697_v9 }
 0x111   : > { %v649_v21 = vpop.f32.mrf.mxu2 }
 0x112   : > { %1034 = vmatmul.bf16.gmra.mxu2 %v796_v20  ;;  %1123 = vmatmul.bf16.gmra.mxu3 %v796_v20  ;;  %v650_v24 = vadd.f32 %v2581_v16, %v649_v21 }
 0x113   : > { %1212 = vmatmul.bf16.gmra.mxu0 %v796_v20  ;;  %1301 = vmatmul.bf16.gmra.mxu1 %v796_v20  ;;  %v612_v23 = vpop.f32.mrf.mxu0 }
 0x114   : > { %v738_v22 = vpop.f32.mrf.mxu3  ;;  %v701_v25 = vpop.f32.mrf.mxu1  ;;  %v613_v26 = vadd.f32 %v2581_v16, %v612_v23 }
 0x115   : > { %v739_v27 = vadd.f32 %v738_v22, %v650_v24 }
 0x116   : > { %v702_v28 = vadd.f32 %v701_v25, %v613_v26 }
 0x117   : > { %784 = vst [vmem:[%s2585_s29 + $0xb8] sm:$0xff] %v739_v27  ;;  %v2625_v29 = vpack.c.bf16 %v739_v27, %v737_v18 }
 0x118   : > { %769 = vst [vmem:[%s2585_s29 + $0x40] sm:$0xff] %v702_v28 }
 0x119   : > { %v652_v30 = vpop.f32.mrf.mxu2 }
 0x11a   : > { %v653_v33 = vadd.f32 %v2581_v16, %v652_v30 }
 0x11b   : > { %v614_v32 = vpop.f32.mrf.mxu0 }
 0x11c   : > { %v741_v31 = vpop.f32.mrf.mxu3  ;;  %v703_v34 = vpop.f32.mrf.mxu1  ;;  %v615_v35 = vadd.f32 %v2581_v16, %v614_v32 }
 0x11d   : > { %v742_v36 = vadd.f32 %v741_v31, %v653_v33 }
 0x11e   : > { %v704_v37 = vadd.f32 %v703_v34, %v615_v35 }
 0x11f   : > { %785 = vst [vmem:[%s2585_s29 + $0xc0] sm:$0xff] %v742_v36 }
 0x120   : > { %770 = vst [vmem:[%s2585_s29 + $0x48] sm:$0xff] %v704_v37  ;;  %v797_v39 = vpack.c.bf16 %v704_v37, %v702_v28 }
 0x121   : > { %v654_v40 = vpop.f32.mrf.mxu2 }
 0x122   : > { %1039 = vmatmul.bf16.gmra.mxu2 %v797_v39  ;;  %1128 = vmatmul.bf16.gmra.mxu3 %v797_v39  ;;  %v655_v43 = vadd.f32 %v2581_v16, %v654_v40  ;;  %v841_v40 = vld [vmem:[#allocation8] sm:$0xf] }
 0x123   : > { %1217 = vmatmul.bf16.gmra.mxu0 %v797_v39  ;;  %1306 = vmatmul.bf16.gmra.mxu1 %v797_v39  ;;  %v617_v42 = vpop.f32.mrf.mxu0 }
 0x124   : > { %v743_v41 = vpop.f32.mrf.mxu3  ;;  %v706_v44 = vpop.f32.mrf.mxu1  ;;  %v618_v45 = vadd.f32 %v2581_v16, %v617_v42  ;;  %v2668_v42 = vperm.slane %v841_v40, 3 }
 0x125   : > { %v744_v46 = vadd.f32 %v743_v41, %v655_v43  ;;  %v2666_v41 = vperm.slane %v841_v40, 2 }
 0x126   : > { %v707_v47 = vadd.f32 %v706_v44, %v618_v45 }
 0x127   : > { %786 = vst [vmem:[%s2585_s29 + $0xc8] sm:$0xff] %v744_v46  ;;  %v2635_v48 = vpack.c.bf16 %v744_v46, %v742_v36 }
 0x128   : > { %771 = vst [vmem:[%s2585_s29 + $0x50] sm:$0xff] %v707_v47 }
 0x129   : > { %v657_v49 = vpop.f32.mrf.mxu2 }
 0x12a   : > { %v658_v52 = vadd.f32 %v2581_v16, %v657_v49 }
 0x12b   : > { %v619_v51 = vpop.f32.mrf.mxu0 }
 0x12c   : > { %v746_v50 = vpop.f32.mrf.mxu3  ;;  %v708_v53 = vpop.f32.mrf.mxu1  ;;  %v620_v54 = vadd.f32 %v2581_v16, %v619_v51 }
 0x12d   : > { %v747_v55 = vadd.f32 %v746_v50, %v658_v52 }
 0x12e   : > { %v709_v57 = vadd.f32 %v708_v53, %v620_v54 }
 0x12f   : > { %787 = vst [vmem:[%s2585_s29 + $0xd0] sm:$0xff] %v747_v55 }
 0x130   : > { %772 = vst [vmem:[%s2585_s29 + $0x58] sm:$0xff] %v709_v57  ;;  %v798_v58 = vpack.c.bf16 %v709_v57, %v707_v47  ;;  %v2676_v47 = vperm.slane %v841_v40, 1 }
 0x131   : > { %v659_v59 = vpop.f32.mrf.mxu2 }
 0x132   : > { %1044 = vmatmul.bf16.gmra.mxu2 %v798_v58  ;;  %1133 = vmatmul.bf16.gmra.mxu3 %v798_v58  ;;  %v660_v62 = vadd.f32 %v2581_v16, %v659_v59 }
 0x133   : > { %1222 = vmatmul.bf16.gmra.mxu0 %v798_v58  ;;  %1311 = vmatmul.bf16.gmra.mxu1 %v798_v58  ;;  %v622_v61 = vpop.f32.mrf.mxu0 }
 0x134   : > { %v748_v60 = vpop.f32.mrf.mxu3  ;;  %v711_v63 = vpop.f32.mrf.mxu1  ;;  %v623_v0 = vadd.f32 %v2581_v16, %v622_v61 }
 0x135   : > { %v749_v1 = vadd.f32 %v748_v60, %v660_v62 }
 0x136   : > { %v712_v2 = vadd.f32 %v711_v63, %v623_v0 }
 0x137   : > { %788 = vst [vmem:[%s2585_s29 + $0xd8] sm:$0xff] %v749_v1  ;;  %v2645_v3 = vpack.c.bf16 %v749_v1, %v747_v55 }
 0x138   : > { %773 = vst [vmem:[%s2585_s29 + $0x60] sm:$0xff] %v712_v2 }
 0x139   : > { %v662_v4 = vpop.f32.mrf.mxu2 }
 0x13a   : > { %v663_v7 = vadd.f32 %v2581_v16, %v662_v4 }
 0x13b   : > { %v624_v6 = vpop.f32.mrf.mxu0 }
 0x13c   : > { %v751_v5 = vpop.f32.mrf.mxu3  ;;  %v713_v8 = vpop.f32.mrf.mxu1  ;;  %v625_v9 = vadd.f32 %v2581_v16, %v624_v6 }
 0x13d   : > { %v752_v11 = vadd.f32 %v751_v5, %v663_v7 }
 0x13e   : > { %v714_v12 = vadd.f32 %v713_v8, %v625_v9 }
 0x13f   : > { %789 = vst [vmem:[%s2585_s29 + $0xe0] sm:$0xff] %v752_v11 }
 0x140   : > { %774 = vst [vmem:[%s2585_s29 + $0x68] sm:$0xff] %v714_v12  ;;  %v799_v13 = vpack.c.bf16 %v714_v12, %v712_v2 }
 0x141   : > { %v664_v14 = vpop.f32.mrf.mxu2 }
 0x142   : > { %1049 = vmatmul.bf16.gmra.mxu2 %v799_v13  ;;  %1138 = vmatmul.bf16.gmra.mxu3 %v799_v13  ;;  %v665_v18 = vadd.f32 %v2581_v16, %v664_v14 }
 0x143   : > { %1227 = vmatmul.bf16.gmra.mxu0 %v799_v13  ;;  %1316 = vmatmul.bf16.gmra.mxu1 %v799_v13  ;;  %v627_v17 = vpop.f32.mrf.mxu0 }
 0x144   : > { %v753_v15 = vpop.f32.mrf.mxu3  ;;  %v716_v19 = vpop.f32.mrf.mxu1  ;;  %v628_v20 = vadd.f32 %v2581_v16, %v627_v17 }
 0x145   : > { %v754_v21 = vadd.f32 %v753_v15, %v665_v18 }
 0x146   : > { %v717_v22 = vadd.f32 %v716_v19, %v628_v20 }
 0x147   : > { %790 = vst [vmem:[%s2585_s29 + $0xe8] sm:$0xff] %v754_v21  ;;  %v2655_v23 = vpack.c.bf16 %v754_v21, %v752_v11 }
 0x148   : > { %775 = vst [vmem:[%s2585_s29 + $0x70] sm:$0xff] %v717_v22 }
 0x149   : > { %v667_v24 = vpop.f32.mrf.mxu2 }
 0x14a   : > { %v668_v27 = vadd.f32 %v2581_v16, %v667_v24 }
 0x14b   : > { %v629_v26 = vpop.f32.mrf.mxu0 }
 0x14c   : > { %v756_v25 = vpop.f32.mrf.mxu3  ;;  %v630_v28 = vadd.f32 %v2581_v16, %v629_v26  ;;  %v718_v30 = vpop.f32.mrf.mxu1 }
 0x14d   : > { %v757_v31 = vadd.f32 %v756_v25, %v668_v27 }
 0x14e   : > { %v719_v32 = vadd.f32 %v718_v30, %v630_v28 }
 0x14f   : > { %791 = vst [vmem:[%s2585_s29 + $0xf0] sm:$0xff] %v757_v31 }
 0x150   : > { %776 = vst [vmem:[%s2585_s29 + $0x78] sm:$0xff] %v719_v32  ;;  %v800_v33 = vpack.c.bf16 %v719_v32, %v717_v22 }
 0x151   : > { %v669_v34 = vpop.f32.mrf.mxu2 }
 0x152   : > { %1054 = vmatmul.bf16.gmra.mxu2 %v800_v33  ;;  %1143 = vmatmul.bf16.gmra.mxu3 %v800_v33  ;;  %v670_v36 = vadd.f32 %v2581_v16, %v669_v34  ;;  %v2674_v16 = vperm.slane %v841_v40, 0 }
 0x153   : > { %1232 = vmatmul.bf16.gmra.mxu0 %v800_v33  ;;  %1321 = vmatmul.bf16.gmra.mxu1 %v800_v33 }
 0x154   : > { %v758_v35 = vpop.f32.mrf.mxu3 }
 0x155   : > { %v759_v37 = vadd.f32 %v758_v35, %v670_v36 }
 0x157   : > { %792 = vst [vmem:[%s2585_s29 + $0xf8] sm:$0xff] %v759_v37  ;;  %v2664_v39 = vpack.c.bf16 %v759_v37, %v757_v31 }
 0x160   : > { %v1198_v43 = vpop.f32.mrf.mxu0  ;;  %v1287_v44 = vpop.f32.mrf.mxu1 }
 0x161   : > { %v1199_v45 = vadd.f32 %v1198_v43, %v2666_v41  ;;  %v1288_v46 = vadd.f32 %v1287_v44, %v2668_v42 }
 0x162   : > { %1059 = vmatmul.bf16.gmra.mxu2 %v2595_v38  ;;  %1148 = vmatmul.bf16.gmra.mxu3 %v2595_v38 }
 0x163   : > { %v1368_v49 = vpack.c.bf16 %v1288_v46, %v1199_v45  ;;  %1237 = vmatmul.bf16.gmra.mxu0 %v2595_v38  ;;  %1326 = vmatmul.bf16.gmra.mxu1 %v2595_v38 }
 0x165   : > { %1432 = vst [vmem:[%s2682_s7 + $0x8] sm:$0xff] %v1368_v49  ;;  %v1020_v50 = vpop.f32.mrf.mxu2  ;;  %v1109_v51 = vpop.f32.mrf.mxu3 }
 0x166   : > { %v1021_v52 = vadd.f32 %v1020_v50, %v2674_v16  ;;  %v1110_v53 = vadd.f32 %v1109_v51, %v2676_v47 }
 0x168   : > { %v1367_v54 = vpack.c.bf16 %v1110_v53, %v1021_v52  ;;  %v1200_v55 = vpop.f32.mrf.mxu0  ;;  %v1289_v57 = vpop.f32.mrf.mxu1 }
 0x169   : > { %v1201_v58 = vadd.f32 %v1200_v55, %v2666_v41  ;;  %v1290_v38 = vadd.f32 %v1289_v57, %v2668_v42 }
 0x16a   : > { %1431 = vst [vmem:[%s2682_s7] sm:$0xff] %v1367_v54 }
 0x16b   : > { %v1370_v59 = vpack.c.bf16 %v1290_v38, %v1201_v58 }
 0x16d   : > { %1434 = vst [vmem:[%s2682_s7 + $0x18] sm:$0xff] %v1370_v59  ;;  %v1022_v60 = vpop.f32.mrf.mxu2  ;;  %v1111_v61 = vpop.f32.mrf.mxu3 }
 0x16e   : > { %v1023_v62 = vadd.f32 %v1022_v60, %v2674_v16  ;;  %v1112_v63 = vadd.f32 %v1111_v61, %v2676_v47 }
 0x170   : > { %v1369_v0 = vpack.c.bf16 %v1112_v63, %v1023_v62  ;;  %v1203_v1 = vpop.f32.mrf.mxu0  ;;  %v1292_v2 = vpop.f32.mrf.mxu1 }
 0x171   : > { %v1204_v4 = vadd.f32 %v1203_v1, %v2666_v41  ;;  %v1293_v5 = vadd.f32 %v1292_v2, %v2668_v42 }
 0x172   : > { %1433 = vst [vmem:[%s2682_s7 + $0x10] sm:$0xff] %v1369_v0  ;;  %1064 = vmatmul.bf16.gmra.mxu2 %v2605_v56  ;;  %1153 = vmatmul.bf16.gmra.mxu3 %v2605_v56 }
 0x173   : > { %v1372_v6 = vpack.c.bf16 %v1293_v5, %v1204_v4  ;;  %1242 = vmatmul.bf16.gmra.mxu0 %v2605_v56  ;;  %1331 = vmatmul.bf16.gmra.mxu1 %v2605_v56 }
 0x175   : > { %1436 = vst [vmem:[%s2682_s7 + $0x28] sm:$0xff] %v1372_v6  ;;  %v1025_v7 = vpop.f32.mrf.mxu2  ;;  %v1114_v8 = vpop.f32.mrf.mxu3 }
 0x176   : > { %v1026_v9 = vadd.f32 %v1025_v7, %v2674_v16  ;;  %v1115_v11 = vadd.f32 %v1114_v8, %v2676_v47 }
 0x178   : > { %v1371_v12 = vpack.c.bf16 %v1115_v11, %v1026_v9  ;;  %v1205_v13 = vpop.f32.mrf.mxu0  ;;  %v1294_v14 = vpop.f32.mrf.mxu1 }
 0x179   : > { %v1206_v15 = vadd.f32 %v1205_v13, %v2666_v41  ;;  %v1295_v17 = vadd.f32 %v1294_v14, %v2668_v42 }
 0x17a   : > { %1435 = vst [vmem:[%s2682_s7 + $0x20] sm:$0xff] %v1371_v12 }
 0x17b   : > { %v1374_v18 = vpack.c.bf16 %v1295_v17, %v1206_v15 }
 0x17d   : > { %1438 = vst [vmem:[%s2682_s7 + $0x38] sm:$0xff] %v1374_v18  ;;  %v1027_v56 = vpop.f32.mrf.mxu2  ;;  %v1116_v19 = vpop.f32.mrf.mxu3 }
 0x17e   : > { %v1028_v20 = vadd.f32 %v1027_v56, %v2674_v16  ;;  %v1117_v21 = vadd.f32 %v1116_v19, %v2676_v47 }
 0x180   : > { %v1373_v22 = vpack.c.bf16 %v1117_v21, %v1028_v20  ;;  %v1208_v24 = vpop.f32.mrf.mxu0  ;;  %v1297_v25 = vpop.f32.mrf.mxu1 }
 0x181   : > { %v1209_v26 = vadd.f32 %v1208_v24, %v2666_v41  ;;  %v1298_v27 = vadd.f32 %v1297_v25, %v2668_v42 }
 0x182   : > { %1437 = vst [vmem:[%s2682_s7 + $0x30] sm:$0xff] %v1373_v22  ;;  %1069 = vmatmul.bf16.gmra.mxu2 %v2615_v10  ;;  %1158 = vmatmul.bf16.gmra.mxu3 %v2615_v10 }
 0x183   : > { %v1376_v28 = vpack.c.bf16 %v1298_v27, %v1209_v26  ;;  %1247 = vmatmul.bf16.gmra.mxu0 %v2615_v10  ;;  %1336 = vmatmul.bf16.gmra.mxu1 %v2615_v10 }
 0x185   : > { %1440 = vst [vmem:[%s2682_s7 + $0x48] sm:$0xff] %v1376_v28  ;;  %v1030_v30 = vpop.f32.mrf.mxu2  ;;  %v1119_v31 = vpop.f32.mrf.mxu3 }
 0x186   : > { %v1031_v32 = vadd.f32 %v1030_v30, %v2674_v16  ;;  %v1120_v33 = vadd.f32 %v1119_v31, %v2676_v47 }
 0x188   : > { %v1375_v34 = vpack.c.bf16 %v1120_v33, %v1031_v32  ;;  %v1210_v35 = vpop.f32.mrf.mxu0  ;;  %v1299_v36 = vpop.f32.mrf.mxu1 }
 0x189   : > { %v1211_v37 = vadd.f32 %v1210_v35, %v2666_v41  ;;  %v1300_v40 = vadd.f32 %v1299_v36, %v2668_v42 }
 0x18a   : > { %1439 = vst [vmem:[%s2682_s7 + $0x40] sm:$0xff] %v1375_v34 }
 0x18b   : > { %v1378_v43 = vpack.c.bf16 %v1300_v40, %v1211_v37 }
 0x18d   : > { %1442 = vst [vmem:[%s2682_s7 + $0x58] sm:$0xff] %v1378_v43  ;;  %v1032_v10 = vpop.f32.mrf.mxu2  ;;  %v1121_v44 = vpop.f32.mrf.mxu3 }
 0x18e   : > { %v1033_v45 = vadd.f32 %v1032_v10, %v2674_v16  ;;  %v1122_v46 = vadd.f32 %v1121_v44, %v2676_v47 }
 0x190   : > { %v1377_v49 = vpack.c.bf16 %v1122_v46, %v1033_v45  ;;  %v1213_v50 = vpop.f32.mrf.mxu0  ;;  %v1302_v51 = vpop.f32.mrf.mxu1 }
 0x191   : > { %v1214_v52 = vadd.f32 %v1213_v50, %v2666_v41  ;;  %v1303_v53 = vadd.f32 %v1302_v51, %v2668_v42 }
 0x192   : > { %1441 = vst [vmem:[%s2682_s7 + $0x50] sm:$0xff] %v1377_v49  ;;  %1074 = vmatmul.bf16.gmra.mxu2 %v2625_v29  ;;  %1163 = vmatmul.bf16.gmra.mxu3 %v2625_v29 }
 0x193   : > { %v1380_v54 = vpack.c.bf16 %v1303_v53, %v1214_v52  ;;  %1252 = vmatmul.bf16.gmra.mxu0 %v2625_v29  ;;  %1341 = vmatmul.bf16.gmra.mxu1 %v2625_v29 }
 0x195   : > { %1444 = vst [vmem:[%s2682_s7 + $0x68] sm:$0xff] %v1380_v54  ;;  %v1035_v55 = vpop.f32.mrf.mxu2  ;;  %v1124_v57 = vpop.f32.mrf.mxu3 }
 0x196   : > { %v1036_v58 = vadd.f32 %v1035_v55, %v2674_v16  ;;  %v1125_v38 = vadd.f32 %v1124_v57, %v2676_v47 }
 0x198   : > { %v1379_v59 = vpack.c.bf16 %v1125_v38, %v1036_v58  ;;  %v1215_v60 = vpop.f32.mrf.mxu0  ;;  %v1304_v61 = vpop.f32.mrf.mxu1 }
 0x199   : > { %v1216_v62 = vadd.f32 %v1215_v60, %v2666_v41  ;;  %v1305_v63 = vadd.f32 %v1304_v61, %v2668_v42 }
 0x19a   : > { %1443 = vst [vmem:[%s2682_s7 + $0x60] sm:$0xff] %v1379_v59 }
 0x19b   : > { %v1382_v0 = vpack.c.bf16 %v1305_v63, %v1216_v62 }
 0x19d   : > { %1446 = vst [vmem:[%s2682_s7 + $0x78] sm:$0xff] %v1382_v0  ;;  %v1037_v29 = vpop.f32.mrf.mxu2  ;;  %v1126_v1 = vpop.f32.mrf.mxu3 }
 0x19e   : > { %v1038_v2 = vadd.f32 %v1037_v29, %v2674_v16  ;;  %v1127_v4 = vadd.f32 %v1126_v1, %v2676_v47 }
 0x1a0   : > { %v1381_v5 = vpack.c.bf16 %v1127_v4, %v1038_v2  ;;  %v1218_v6 = vpop.f32.mrf.mxu0  ;;  %v1307_v7 = vpop.f32.mrf.mxu1 }
 0x1a1   : > { %v1219_v8 = vadd.f32 %v1218_v6, %v2666_v41  ;;  %v1308_v9 = vadd.f32 %v1307_v7, %v2668_v42 }
 0x1a2   : > { %1445 = vst [vmem:[%s2682_s7 + $0x70] sm:$0xff] %v1381_v5  ;;  %1079 = vmatmul.bf16.gmra.mxu2 %v2635_v48  ;;  %1168 = vmatmul.bf16.gmra.mxu3 %v2635_v48 }
 0x1a3   : > { %v1384_v11 = vpack.c.bf16 %v1308_v9, %v1219_v8  ;;  %1257 = vmatmul.bf16.gmra.mxu0 %v2635_v48  ;;  %1346 = vmatmul.bf16.gmra.mxu1 %v2635_v48 }
 0x1a5   : > { %1448 = vst [vmem:[%s2682_s7 + $0x88] sm:$0xff] %v1384_v11  ;;  %v1040_v12 = vpop.f32.mrf.mxu2  ;;  %v1129_v13 = vpop.f32.mrf.mxu3 }
 0x1a6   : > { %v1041_v14 = vadd.f32 %v1040_v12, %v2674_v16  ;;  %v1130_v15 = vadd.f32 %v1129_v13, %v2676_v47 }
 0x1a8   : > { %v1383_v17 = vpack.c.bf16 %v1130_v15, %v1041_v14  ;;  %v1220_v18 = vpop.f32.mrf.mxu0  ;;  %v1309_v56 = vpop.f32.mrf.mxu1 }
 0x1a9   : > { %v1221_v19 = vadd.f32 %v1220_v18, %v2666_v41  ;;  %v1310_v20 = vadd.f32 %v1309_v56, %v2668_v42 }
 0x1aa   : > { %1447 = vst [vmem:[%s2682_s7 + $0x80] sm:$0xff] %v1383_v17 }
 0x1ab   : > { %v1386_v21 = vpack.c.bf16 %v1310_v20, %v1221_v19 }
 0x1ad   : > { %1450 = vst [vmem:[%s2682_s7 + $0x98] sm:$0xff] %v1386_v21  ;;  %v1042_v48 = vpop.f32.mrf.mxu2  ;;  %v1131_v22 = vpop.f32.mrf.mxu3 }
 0x1ae   : > { %v1043_v24 = vadd.f32 %v1042_v48, %v2674_v16  ;;  %v1132_v25 = vadd.f32 %v1131_v22, %v2676_v47 }
 0x1b0   : > { %v1385_v26 = vpack.c.bf16 %v1132_v25, %v1043_v24  ;;  %v1223_v27 = vpop.f32.mrf.mxu0  ;;  %v1312_v28 = vpop.f32.mrf.mxu1 }
 0x1b1   : > { %v1224_v30 = vadd.f32 %v1223_v27, %v2666_v41  ;;  %v1313_v31 = vadd.f32 %v1312_v28, %v2668_v42 }
 0x1b2   : > { %1449 = vst [vmem:[%s2682_s7 + $0x90] sm:$0xff] %v1385_v26  ;;  %1084 = vmatmul.bf16.gmra.mxu2 %v2645_v3  ;;  %1173 = vmatmul.bf16.gmra.mxu3 %v2645_v3 }
 0x1b3   : > { %v1388_v32 = vpack.c.bf16 %v1313_v31, %v1224_v30  ;;  %1262 = vmatmul.bf16.gmra.mxu0 %v2645_v3  ;;  %1351 = vmatmul.bf16.gmra.mxu1 %v2645_v3 }
 0x1b5   : > { %1452 = vst [vmem:[%s2682_s7 + $0xa8] sm:$0xff] %v1388_v32  ;;  %v1045_v33 = vpop.f32.mrf.mxu2  ;;  %v1134_v34 = vpop.f32.mrf.mxu3 }
 0x1b6   : > { %v1046_v35 = vadd.f32 %v1045_v33, %v2674_v16  ;;  %v1135_v36 = vadd.f32 %v1134_v34, %v2676_v47 }
 0x1b8   : > { %v1387_v37 = vpack.c.bf16 %v1135_v36, %v1046_v35  ;;  %v1225_v40 = vpop.f32.mrf.mxu0  ;;  %v1314_v43 = vpop.f32.mrf.mxu1 }
 0x1b9   : > { %v1226_v10 = vadd.f32 %v1225_v40, %v2666_v41  ;;  %v1315_v44 = vadd.f32 %v1314_v43, %v2668_v42 }
 0x1ba   : > { %1451 = vst [vmem:[%s2682_s7 + $0xa0] sm:$0xff] %v1387_v37 }
 0x1bb   : > { %v1390_v45 = vpack.c.bf16 %v1315_v44, %v1226_v10 }
 0x1bd   : > { %1454 = vst [vmem:[%s2682_s7 + $0xb8] sm:$0xff] %v1390_v45  ;;  %v1047_v3 = vpop.f32.mrf.mxu2  ;;  %v1136_v46 = vpop.f32.mrf.mxu3 }
 0x1be   : > { %v1048_v49 = vadd.f32 %v1047_v3, %v2674_v16  ;;  %v1137_v50 = vadd.f32 %v1136_v46, %v2676_v47 }
 0x1c0   : > { %v1389_v51 = vpack.c.bf16 %v1137_v50, %v1048_v49  ;;  %v1228_v52 = vpop.f32.mrf.mxu0  ;;  %v1317_v53 = vpop.f32.mrf.mxu1 }
 0x1c1   : > { %v1229_v54 = vadd.f32 %v1228_v52, %v2666_v41  ;;  %v1318_v55 = vadd.f32 %v1317_v53, %v2668_v42 }
 0x1c2   : > { %1453 = vst [vmem:[%s2682_s7 + $0xb0] sm:$0xff] %v1389_v51  ;;  %1089 = vmatmul.bf16.gmra.mxu2 %v2655_v23  ;;  %1178 = vmatmul.bf16.gmra.mxu3 %v2655_v23 }
 0x1c3   : > { %v1392_v57 = vpack.c.bf16 %v1318_v55, %v1229_v54  ;;  %1267 = vmatmul.bf16.gmra.mxu0 %v2655_v23  ;;  %1356 = vmatmul.bf16.gmra.mxu1 %v2655_v23 }
 0x1c5   : > { %1456 = vst [vmem:[%s2682_s7 + $0xc8] sm:$0xff] %v1392_v57  ;;  %v1050_v58 = vpop.f32.mrf.mxu2  ;;  %v1139_v38 = vpop.f32.mrf.mxu3 }
 0x1c6   : > { %v1051_v59 = vadd.f32 %v1050_v58, %v2674_v16  ;;  %v1140_v60 = vadd.f32 %v1139_v38, %v2676_v47 }
 0x1c8   : > { %v1391_v61 = vpack.c.bf16 %v1140_v60, %v1051_v59  ;;  %v1230_v62 = vpop.f32.mrf.mxu0  ;;  %v1319_v63 = vpop.f32.mrf.mxu1 }
 0x1c9   : > { %v1231_v0 = vadd.f32 %v1230_v62, %v2666_v41  ;;  %v1320_v29 = vadd.f32 %v1319_v63, %v2668_v42 }
 0x1ca   : > { %1455 = vst [vmem:[%s2682_s7 + $0xc0] sm:$0xff] %v1391_v61 }
 0x1cb   : > { %v1394_v1 = vpack.c.bf16 %v1320_v29, %v1231_v0 }
 0x1cd   : > { %1458 = vst [vmem:[%s2682_s7 + $0xd8] sm:$0xff] %v1394_v1  ;;  %v1052_v23 = vpop.f32.mrf.mxu2  ;;  %v1141_v2 = vpop.f32.mrf.mxu3 }
 0x1ce   : > { %v1053_v4 = vadd.f32 %v1052_v23, %v2674_v16  ;;  %v1142_v5 = vadd.f32 %v1141_v2, %v2676_v47 }
 0x1d0   : > { %v1393_v6 = vpack.c.bf16 %v1142_v5, %v1053_v4  ;;  %v1233_v7 = vpop.f32.mrf.mxu0  ;;  %v1322_v8 = vpop.f32.mrf.mxu1 }
 0x1d1   : > { %v1234_v9 = vadd.f32 %v1233_v7, %v2666_v41  ;;  %v1323_v11 = vadd.f32 %v1322_v8, %v2668_v42 }
 0x1d2   : > { %1457 = vst [vmem:[%s2682_s7 + $0xd0] sm:$0xff] %v1393_v6  ;;  %1094 = vmatmul.bf16.gmra.mxu2 %v2664_v39  ;;  %1183 = vmatmul.bf16.gmra.mxu3 %v2664_v39 }
 0x1d3   : > { %v1396_v12 = vpack.c.bf16 %v1323_v11, %v1234_v9  ;;  %1272 = vmatmul.bf16.gmra.mxu0 %v2664_v39  ;;  %1361 = vmatmul.bf16.gmra.mxu1 %v2664_v39 }
 0x1d5   : > { %1460 = vst [vmem:[%s2682_s7 + $0xe8] sm:$0xff] %v1396_v12  ;;  %v1055_v13 = vpop.f32.mrf.mxu2  ;;  %v1144_v14 = vpop.f32.mrf.mxu3 }
 0x1d6   : > { %v1056_v15 = vadd.f32 %v1055_v13, %v2674_v16  ;;  %v1145_v17 = vadd.f32 %v1144_v14, %v2676_v47 }
 0x1d8   : > { %v1395_v18 = vpack.c.bf16 %v1145_v17, %v1056_v15  ;;  %v1235_v56 = vpop.f32.mrf.mxu0  ;;  %v1324_v19 = vpop.f32.mrf.mxu1 }
 0x1d9   : > { %v1236_v20 = vadd.f32 %v1235_v56, %v2666_v41  ;;  %v1325_v21 = vadd.f32 %v1324_v19, %v2668_v42 }
 0x1da   : > { %1459 = vst [vmem:[%s2682_s7 + $0xe0] sm:$0xff] %v1395_v18 }
 0x1db   : > { %v1398_v48 = vpack.c.bf16 %v1325_v21, %v1236_v20 }
 0x1dd   : > { %1462 = vst [vmem:[%s2682_s7 + $0xf8] sm:$0xff] %v1398_v48  ;;  %v1057_v39 = vpop.f32.mrf.mxu2  ;;  %v1146_v22 = vpop.f32.mrf.mxu3 }
 0x1de   : > { %v1058_v24 = vadd.f32 %v1057_v39, %v2674_v16  ;;  %v1147_v25 = vadd.f32 %v1146_v22, %v2676_v47 }
 0x1e0   : > { %v1397_v26 = vpack.c.bf16 %v1147_v25, %v1058_v24  ;;  %v1238_v27 = vpop.f32.mrf.mxu0  ;;  %v1327_v28 = vpop.f32.mrf.mxu1 }
 0x1e1   : > { %v1239_v30 = vadd.f32 %v1238_v27, %v2666_v41  ;;  %v1328_v31 = vadd.f32 %v1327_v28, %v2668_v42 }
 0x1e2   : > { %1461 = vst [vmem:[%s2682_s7 + $0xf0] sm:$0xff] %v1397_v26 }
 0x1e3   : > { %v1400_v32 = vpack.c.bf16 %v1328_v31, %v1239_v30 }
 0x1e5   : > { %1464 = vst [vmem:[%s2682_s7 + $0x108] sm:$0xff] %v1400_v32  ;;  %v1060_v33 = vpop.f32.mrf.mxu2  ;;  %v1149_v34 = vpop.f32.mrf.mxu3 }
 0x1e6   : > { %v1061_v35 = vadd.f32 %v1060_v33, %v2674_v16  ;;  %v1150_v36 = vadd.f32 %v1149_v34, %v2676_v47 }
 0x1e7   : > { %2228 = shalt.err (!%p2225_p0)
}
 0x1e8   : > { %s2332_s4 = smov 128   ;;  %s2333_s29 = smov 8   ;;  %v1399_v37 = vpack.c.bf16 %v1150_v36, %v1061_v35  ;;  %v1240_v40 = vpop.f32.mrf.mxu0  ;;  %v1329_v43 = vpop.f32.mrf.mxu1 }
 0x1e9   : > { %1988 = dma.vmem_to_hbm [thread:$0]  (%p2463_p3), %s1516_s13, 4096, %s1518_s16, %s1496_s17, %s2332_s4, %s2332_s4, %s2333_s29   ;;  %v1241_v10 = vadd.f32 %v1240_v40, %v2666_v41  ;;  %v1330_v44 = vadd.f32 %v1329_v43, %v2668_v42 }
 0x1ea   : > { %1463 = vst [vmem:[%s2682_s7 + $0x100] sm:$0xff] %v1399_v37  ;;  %s1957_s12 = sshll.u32 %s2315_s24, 9  ;;  %s1535_s13 = sshll.u32 %s2682_s7, 4  ;;  %s1536_s13 = int_to_ptr.vmem [resolvable:$true] %s1535_s13 }
 0x1eb   : > { %v1402_v45 = vpack.c.bf16 %v1330_v44, %v1241_v10  ;;  %s1534_s15 = scalar_lea.hbm %s2963_s6, %s1957_s12  ;;  %s1501_s24 = scalar_lea.sflag [#allocation12], %s2494_s19 }
 0x1ec   : > { %s1537_s16 = sshll.u32 %s1534_s15, 4  ;;  %s2249_s28 = scalar_lea.hbm %s2963_s6, 1024  ;;  %s1538_s16 = int_to_ptr.hbm [resolvable:$true] %s1537_s16 }
 0x1ed   : > { %1466 = vst [vmem:[%s2682_s7 + $0x118] sm:$0xff] %v1402_v45  ;;  %v1062_v3 = vpop.f32.mrf.mxu2  ;;  %v1151_v46 = vpop.f32.mrf.mxu3  ;;  %s2243_s17 = sshra.s32 %s1538_s16, 4  ;;  %s2244_s17 = int_to_ptr.hbm [resolvable:$true] %s2243_s17 }
 0x1ee   : > { %v1063_v49 = vadd.f32 %v1062_v3, %v2674_v16  ;;  %v1152_v50 = vadd.f32 %v1151_v46, %v2676_v47  ;;  %s2245_s11 = scalar_lea.hbm %s2244_s17, 512  ;;  %p2250_p2 = scmp.lt.s32.totalorder %s2244_s17, %s2963_s6 }
 0x1ef   : > { %p2246_p5 = scmp.ne.s32.totalorder %s2244_s17, %s2245_s11  ;;  %p2251_p1 = scmp.lt.s32.totalorder %s2249_s28, %s2245_s11 }
 0x1f0   : > { %v1401_v51 = vpack.c.bf16 %v1152_v50, %v1063_v49  ;;  %v1243_v52 = vpop.f32.mrf.mxu0  ;;  %v1332_v53 = vpop.f32.mrf.mxu1 }
 0x1f1   : > { %v1244_v54 = vadd.f32 %v1243_v52, %v2666_v41  ;;  %v1333_v55 = vadd.f32 %v1332_v53, %v2668_v42  ;;  %p2247_p7 = pnand %p2246_p5, %p2463_p3  ;;  %p2252_p4 = por %p2251_p1, %p2250_p2 }
 0x1f2   : > { %1465 = vst [vmem:[%s2682_s7 + $0x110] sm:$0xff] %v1401_v51 }
 0x1f3   : > { %v1404_v57 = vpack.c.bf16 %v1333_v55, %v1244_v54  ;;  %p2248_p9 = pneg %p2247_p7 }
 0x1f5   : > { %1468 = vst [vmem:[%s2682_s7 + $0x128] sm:$0xff] %v1404_v57  ;;  %v1065_v58 = vpop.f32.mrf.mxu2  ;;  %v1154_v38 = vpop.f32.mrf.mxu3  ;;  %p2253_p8 = pnand %p2252_p4, %p2248_p9 }
 0x1f6   : > { %v1066_v59 = vadd.f32 %v1065_v58, %v2674_v16  ;;  %v1155_v60 = vadd.f32 %v1154_v38, %v2676_v47 }
 0x1f8   : > { %v1403_v61 = vpack.c.bf16 %v1155_v60, %v1066_v59  ;;  %v1245_v62 = vpop.f32.mrf.mxu0  ;;  %v1334_v63 = vpop.f32.mrf.mxu1 }
 0x1f9   : > { %v1246_v0 = vadd.f32 %v1245_v62, %v2666_v41  ;;  %v1335_v29 = vadd.f32 %v1334_v63, %v2668_v42 }
 0x1fa   : > { %1467 = vst [vmem:[%s2682_s7 + $0x120] sm:$0xff] %v1403_v61 }
 0x1fb   : > { %v1406_v1 = vpack.c.bf16 %v1335_v29, %v1246_v0 }
 0x1fd   : > { %1470 = vst [vmem:[%s2682_s7 + $0x138] sm:$0xff] %v1406_v1  ;;  %v1067_v23 = vpop.f32.mrf.mxu2  ;;  %v1156_v2 = vpop.f32.mrf.mxu3 }
 0x1fe   : > { %v1068_v4 = vadd.f32 %v1067_v23, %v2674_v16  ;;  %v1157_v5 = vadd.f32 %v1156_v2, %v2676_v47 }
 0x200   : > { %v1405_v6 = vpack.c.bf16 %v1157_v5, %v1068_v4  ;;  %v1248_v7 = vpop.f32.mrf.mxu0  ;;  %v1337_v8 = vpop.f32.mrf.mxu1 }
 0x201   : > { %v1249_v9 = vadd.f32 %v1248_v7, %v2666_v41  ;;  %v1338_v11 = vadd.f32 %v1337_v8, %v2668_v42 }
 0x202   : > { %1469 = vst [vmem:[%s2682_s7 + $0x130] sm:$0xff] %v1405_v6 }
 0x203   : > { %v1408_v12 = vpack.c.bf16 %v1338_v11, %v1249_v9 }
 0x205   : > { %1472 = vst [vmem:[%s2682_s7 + $0x148] sm:$0xff] %v1408_v12  ;;  %v1070_v13 = vpop.f32.mrf.mxu2  ;;  %v1159_v14 = vpop.f32.mrf.mxu3 }
 0x206   : > { %v1071_v15 = vadd.f32 %v1070_v13, %v2674_v16  ;;  %v1160_v17 = vadd.f32 %v1159_v14, %v2676_v47 }
 0x208   : > { %v1407_v18 = vpack.c.bf16 %v1160_v17, %v1071_v15  ;;  %v1250_v56 = vpop.f32.mrf.mxu0  ;;  %v1339_v19 = vpop.f32.mrf.mxu1 }
 0x209   : > { %v1251_v20 = vadd.f32 %v1250_v56, %v2666_v41  ;;  %v1340_v21 = vadd.f32 %v1339_v19, %v2668_v42 }
 0x20a   : > { %1471 = vst [vmem:[%s2682_s7 + $0x140] sm:$0xff] %v1407_v18 }
 0x20b   : > { %v1410_v48 = vpack.c.bf16 %v1340_v21, %v1251_v20 }
 0x20d   : > { %1474 = vst [vmem:[%s2682_s7 + $0x158] sm:$0xff] %v1410_v48  ;;  %v1072_v39 = vpop.f32.mrf.mxu2  ;;  %v1161_v22 = vpop.f32.mrf.mxu3 }
 0x20e   : > { %v1073_v24 = vadd.f32 %v1072_v39, %v2674_v16  ;;  %v1162_v25 = vadd.f32 %v1161_v22, %v2676_v47 }
 0x210   : > { %v1409_v26 = vpack.c.bf16 %v1162_v25, %v1073_v24  ;;  %v1253_v27 = vpop.f32.mrf.mxu0  ;;  %v1342_v28 = vpop.f32.mrf.mxu1 }
 0x211   : > { %v1254_v30 = vadd.f32 %v1253_v27, %v2666_v41  ;;  %v1343_v31 = vadd.f32 %v1342_v28, %v2668_v42 }
 0x212   : > { %1473 = vst [vmem:[%s2682_s7 + $0x150] sm:$0xff] %v1409_v26 }
 0x213   : > { %v1412_v32 = vpack.c.bf16 %v1343_v31, %v1254_v30 }
 0x215   : > { %1476 = vst [vmem:[%s2682_s7 + $0x168] sm:$0xff] %v1412_v32  ;;  %v1075_v33 = vpop.f32.mrf.mxu2  ;;  %v1164_v34 = vpop.f32.mrf.mxu3 }
 0x216   : > { %v1076_v35 = vadd.f32 %v1075_v33, %v2674_v16  ;;  %v1165_v36 = vadd.f32 %v1164_v34, %v2676_v47 }
 0x218   : > { %v1411_v37 = vpack.c.bf16 %v1165_v36, %v1076_v35  ;;  %v1255_v40 = vpop.f32.mrf.mxu0  ;;  %v1344_v43 = vpop.f32.mrf.mxu1 }
 0x219   : > { %v1256_v10 = vadd.f32 %v1255_v40, %v2666_v41  ;;  %v1345_v44 = vadd.f32 %v1344_v43, %v2668_v42 }
 0x21a   : > { %1475 = vst [vmem:[%s2682_s7 + $0x160] sm:$0xff] %v1411_v37 }
 0x21b   : > { %v1414_v45 = vpack.c.bf16 %v1345_v44, %v1256_v10 }
 0x21d   : > { %1478 = vst [vmem:[%s2682_s7 + $0x178] sm:$0xff] %v1414_v45  ;;  %v1077_v3 = vpop.f32.mrf.mxu2  ;;  %v1166_v46 = vpop.f32.mrf.mxu3 }
 0x21e   : > { %v1078_v49 = vadd.f32 %v1077_v3, %v2674_v16  ;;  %v1167_v50 = vadd.f32 %v1166_v46, %v2676_v47 }
 0x220   : > { %v1413_v51 = vpack.c.bf16 %v1167_v50, %v1078_v49  ;;  %v1258_v52 = vpop.f32.mrf.mxu0  ;;  %v1347_v53 = vpop.f32.mrf.mxu1 }
 0x221   : > { %v1259_v54 = vadd.f32 %v1258_v52, %v2666_v41  ;;  %v1348_v55 = vadd.f32 %v1347_v53, %v2668_v42 }
 0x222   : > { %1477 = vst [vmem:[%s2682_s7 + $0x170] sm:$0xff] %v1413_v51 }
 0x223   : > { %v1416_v57 = vpack.c.bf16 %v1348_v55, %v1259_v54 }
 0x225   : > { %1480 = vst [vmem:[%s2682_s7 + $0x188] sm:$0xff] %v1416_v57  ;;  %v1080_v58 = vpop.f32.mrf.mxu2  ;;  %v1169_v38 = vpop.f32.mrf.mxu3 }
 0x226   : > { %v1081_v59 = vadd.f32 %v1080_v58, %v2674_v16  ;;  %v1170_v60 = vadd.f32 %v1169_v38, %v2676_v47 }
 0x228   : > { %v1415_v61 = vpack.c.bf16 %v1170_v60, %v1081_v59  ;;  %v1260_v62 = vpop.f32.mrf.mxu0  ;;  %v1349_v63 = vpop.f32.mrf.mxu1 }
 0x229   : > { %v1261_v0 = vadd.f32 %v1260_v62, %v2666_v41  ;;  %v1350_v29 = vadd.f32 %v1349_v63, %v2668_v42 }
 0x22a   : > { %1479 = vst [vmem:[%s2682_s7 + $0x180] sm:$0xff] %v1415_v61 }
 0x22b   : > { %v1418_v1 = vpack.c.bf16 %v1350_v29, %v1261_v0 }
 0x22d   : > { %1482 = vst [vmem:[%s2682_s7 + $0x198] sm:$0xff] %v1418_v1  ;;  %v1082_v23 = vpop.f32.mrf.mxu2  ;;  %v1171_v2 = vpop.f32.mrf.mxu3 }
 0x22e   : > { %v1083_v4 = vadd.f32 %v1082_v23, %v2674_v16  ;;  %v1172_v5 = vadd.f32 %v1171_v2, %v2676_v47 }
 0x230   : > { %v1417_v6 = vpack.c.bf16 %v1172_v5, %v1083_v4  ;;  %v1263_v7 = vpop.f32.mrf.mxu0  ;;  %v1352_v8 = vpop.f32.mrf.mxu1 }
 0x231   : > { %v1264_v9 = vadd.f32 %v1263_v7, %v2666_v41  ;;  %v1353_v11 = vadd.f32 %v1352_v8, %v2668_v42 }
 0x232   : > { %1481 = vst [vmem:[%s2682_s7 + $0x190] sm:$0xff] %v1417_v6 }
 0x233   : > { %v1420_v12 = vpack.c.bf16 %v1353_v11, %v1264_v9 }
 0x235   : > { %1484 = vst [vmem:[%s2682_s7 + $0x1a8] sm:$0xff] %v1420_v12  ;;  %v1085_v13 = vpop.f32.mrf.mxu2  ;;  %v1174_v14 = vpop.f32.mrf.mxu3 }
 0x236   : > { %v1086_v15 = vadd.f32 %v1085_v13, %v2674_v16  ;;  %v1175_v17 = vadd.f32 %v1174_v14, %v2676_v47 }
 0x238   : > { %v1419_v18 = vpack.c.bf16 %v1175_v17, %v1086_v15  ;;  %v1265_v56 = vpop.f32.mrf.mxu0  ;;  %v1354_v19 = vpop.f32.mrf.mxu1 }
 0x239   : > { %v1266_v20 = vadd.f32 %v1265_v56, %v2666_v41  ;;  %v1355_v21 = vadd.f32 %v1354_v19, %v2668_v42 }
 0x23a   : > { %1483 = vst [vmem:[%s2682_s7 + $0x1a0] sm:$0xff] %v1419_v18 }
 0x23b   : > { %v1422_v48 = vpack.c.bf16 %v1355_v21, %v1266_v20 }
 0x23d   : > { %1486 = vst [vmem:[%s2682_s7 + $0x1b8] sm:$0xff] %v1422_v48  ;;  %v1087_v39 = vpop.f32.mrf.mxu2  ;;  %v1176_v22 = vpop.f32.mrf.mxu3 }
 0x23e   : > { %v1088_v24 = vadd.f32 %v1087_v39, %v2674_v16  ;;  %v1177_v25 = vadd.f32 %v1176_v22, %v2676_v47 }
 0x240   : > { %v1421_v26 = vpack.c.bf16 %v1177_v25, %v1088_v24  ;;  %v1268_v27 = vpop.f32.mrf.mxu0  ;;  %v1357_v28 = vpop.f32.mrf.mxu1 }
 0x241   : > { %v1269_v30 = vadd.f32 %v1268_v27, %v2666_v41  ;;  %v1358_v31 = vadd.f32 %v1357_v28, %v2668_v42 }
 0x242   : > { %1485 = vst [vmem:[%s2682_s7 + $0x1b0] sm:$0xff] %v1421_v26 }
 0x243   : > { %v1424_v32 = vpack.c.bf16 %v1358_v31, %v1269_v30 }
 0x245   : > { %1488 = vst [vmem:[%s2682_s7 + $0x1c8] sm:$0xff] %v1424_v32  ;;  %v1090_v33 = vpop.f32.mrf.mxu2  ;;  %v1179_v34 = vpop.f32.mrf.mxu3 }
 0x246   : > { %v1091_v35 = vadd.f32 %v1090_v33, %v2674_v16  ;;  %v1180_v36 = vadd.f32 %v1179_v34, %v2676_v47 }
 0x248   : > { %v1423_v37 = vpack.c.bf16 %v1180_v36, %v1091_v35  ;;  %v1270_v40 = vpop.f32.mrf.mxu0  ;;  %v1359_v43 = vpop.f32.mrf.mxu1 }
 0x249   : > { %v1271_v10 = vadd.f32 %v1270_v40, %v2666_v41  ;;  %v1360_v44 = vadd.f32 %v1359_v43, %v2668_v42 }
 0x24a   : > { %1487 = vst [vmem:[%s2682_s7 + $0x1c0] sm:$0xff] %v1423_v37 }
 0x24b   : > { %v1426_v45 = vpack.c.bf16 %v1360_v44, %v1271_v10 }
 0x24d   : > { %1490 = vst [vmem:[%s2682_s7 + $0x1d8] sm:$0xff] %v1426_v45  ;;  %v1092_v3 = vpop.f32.mrf.mxu2  ;;  %v1181_v46 = vpop.f32.mrf.mxu3 }
 0x24e   : > { %v1093_v49 = vadd.f32 %v1092_v3, %v2674_v16  ;;  %v1182_v50 = vadd.f32 %v1181_v46, %v2676_v47 }
 0x250   : > { %v1425_v51 = vpack.c.bf16 %v1182_v50, %v1093_v49  ;;  %v1273_v52 = vpop.f32.mrf.mxu0  ;;  %v1362_v53 = vpop.f32.mrf.mxu1 }
 0x251   : > { %v1274_v54 = vadd.f32 %v1273_v52, %v2666_v41  ;;  %v1363_v55 = vadd.f32 %v1362_v53, %v2668_v42 }
 0x252   : > { %1489 = vst [vmem:[%s2682_s7 + $0x1d0] sm:$0xff] %v1425_v51 }
 0x253   : > { %v1428_v57 = vpack.c.bf16 %v1363_v55, %v1274_v54 }
 0x255   : > { %1492 = vst [vmem:[%s2682_s7 + $0x1e8] sm:$0xff] %v1428_v57  ;;  %v1095_v58 = vpop.f32.mrf.mxu2  ;;  %v1184_v38 = vpop.f32.mrf.mxu3 }
 0x256   : > { %v1096_v59 = vadd.f32 %v1095_v58, %v2674_v16  ;;  %v1185_v60 = vadd.f32 %v1184_v38, %v2676_v47 }
 0x258   : > { %v1427_v61 = vpack.c.bf16 %v1185_v60, %v1096_v59  ;;  %v1275_v62 = vpop.f32.mrf.mxu0  ;;  %v1364_v63 = vpop.f32.mrf.mxu1 }
 0x259   : > { %v1276_v0 = vadd.f32 %v1275_v62, %v2666_v41  ;;  %v1365_v29 = vadd.f32 %v1364_v63, %v2668_v42 }
 0x25a   : > { %1491 = vst [vmem:[%s2682_s7 + $0x1e0] sm:$0xff] %v1427_v61 }
 0x25b   : > { %v1430_v1 = vpack.c.bf16 %v1365_v29, %v1276_v0 }
 0x25d   : > { %1494 = vst [vmem:[%s2682_s7 + $0x1f8] sm:$0xff] %v1430_v1  ;;  %v1097_v23 = vpop.f32.mrf.mxu2  ;;  %v1186_v2 = vpop.f32.mrf.mxu3 }
 0x25e   : > { %v1098_v4 = vadd.f32 %v1097_v23, %v2674_v16  ;;  %v1187_v5 = vadd.f32 %v1186_v2, %v2676_v47 }
 0x260   : > { %v1429_v41 = vpack.c.bf16 %v1187_v5, %v1098_v4 }
 0x262   : > { %1493 = vst [vmem:[%s2682_s7 + $0x1f0] sm:$0xff] %v1429_v41 }
 0x263   : > { %2256 = shalt.err (!%p2253_p8)
}
 0x264   : > { %s2334_s19 = smov 256   ;;  %s2335_s7 = smov 16  }
 0x265   : > { %1989 = dma.vmem_to_hbm [thread:$0]  (%p2463_p3), %s1536_s13, 8192, %s1538_s16, %s1501_s24, %s2334_s19, %s2334_s19, %s2335_s7  }
 0x266 PF: > { %s1552_s3 = sand.u32 1, %s2303_s21   ;;  %p2007_p10 = pnand %p1696_p11, %p2420_p6 }
 0x267   : > { %s1553_s4 = scalar_lea.sflag [#allocation4], %s1552_s3 }
 0x268   : > { %p2008_p12 = pneg %p2007_p10 }
 0x26a   : > { %2294 = dma.done.wait (%p2008_p12), %s1553_s4, 4096  }
 0x26b   : > { %2296 = vsyncadd (%p2008_p12), %s1553_s4, 4294963200  ;;  %s1563_s29 = scalar_lea.sflag [#allocation12], %s1552_s3 }
 0x26c   : > { %2298 = dma.done.wait (%p2008_p12), %s1563_s29, 8192  }
 0x26d   : > { %2300 = vsyncadd (%p2008_p12), %s1563_s29, 4294959104  ;;  %s28_s26 = sadd.s32 1, %s2323_s26   ;;  %s2984_s18 = sld [smem:[#allocation18_spill]] }
 0x26e   : > { %p25_p13 = scmp.ge.s32.totalorder %s28_s26, 4   ;;  %s2985_s21 = smov %s2307_s22 }
 0x26f   : > { %s2986_s22 = smov %s2311_s23  ;;  %s2987_s23 = smov %s2479_s30 }
 0x270   : > { %s2988_s24 = smov %s2319_s25  ;;  %27 = sbr.rel (!%p25_p13) target bundleno = 14 (0xe), region = 114 }
 0x273   : > { %s2989_s25 = smov %s2984_s18 }
 0x275   :  { %1569 = vsyncpa [#allocation3], 1 }
 0x276   :  { %1571 = vsyncpa [#allocation3 + $0x1], 1 }
 0x277   :  { %1572 = vsyncpa [#allocation6], 1 }
 0x278   :  { %1573 = vsyncpa [#allocation9], 1 }
 0x279   :  { %1574 = vsyncpa [#allocation4], 1 }
 0x27a   :  { %1576 = vsyncpa [#allocation4 + $0x1], 1 }
 0x27b   :  { %1577 = vsyncpa [#allocation12], 1 }
 0x27c   :  { %1579 = vsyncpa [#allocation12 + $0x1], 1 }

</bundles_post_ra>
